<compile_context>
chip_gen: v5e
topology: v5e:2x2
jax: 0.10.0
libtpu: 0.0.40
codegen_flags: <defaults>
</compile_context>

<pallas_src>
import math

import jax
import jax.numpy as jnp
from jax.experimental import pallas as pl
from jax.experimental.pallas import tpu as pltpu

STATE_NUMBER = 4
ACTION_NUMBER = 2
ACTOR_HIDDEN = [256, 256]
CRITIC_HIDDEN = [256, 256, 256]  # initialized (like __init__) but unused in forward

LANE_PAD = 128     # lane-dense padded width for the 2-wide head
NEG_BIG = -1e30    # bias for padded logit lanes -> exp underflows to exactly 0


def _actor_kernel(x_ref, w1_ref, b1_ref, w2_ref, b2_ref, w3_ref, b3_ref, o_ref):
    # x: [TB,4] f32 | w1: [4,256] f32 | w2: [256,256] bf16 | w3: [256,128] bf16
    x = x_ref[...]
    w1 = w1_ref[...]

    # Layer 1 on the VPU: K=4 would waste >96% of the MXU contraction rows.
    h1 = b1_ref[...] + x[:, 0:1] * w1[0:1, :]
    h1 = h1 + x[:, 1:2] * w1[1:2, :]
    h1 = h1 + x[:, 2:3] * w1[2:3, :]
    h1 = h1 + x[:, 3:4] * w1[3:4, :]
    h1 = jnp.maximum(h1, 0.0)                                   # [TB, 256] f32

    # Layers 2 & 3: bf16 MXU inputs, f32 accumulation, f32 elementwise.
    h2 = jnp.dot(h1.astype(jnp.bfloat16), w2_ref[...],
                 preferred_element_type=jnp.float32) + b2_ref[...]
    h2 = jnp.maximum(h2, 0.0)                                   # [TB, 256] f32
    logits = jnp.dot(h2.astype(jnp.bfloat16), w3_ref[...],
                     preferred_element_type=jnp.float32) + b3_ref[...]

    # Softmax over the action axis; padded lanes carry NEG_BIG bias -> exp == 0,
    # so this equals torch Softmax(dim=0) applied to each state's 2 logits.
    m = jnp.max(logits, axis=-1, keepdims=True)
    e = jnp.exp(logits - m)
    o_ref[...] = e / jnp.sum(e, axis=-1, keepdims=True)         # [TB, 128] f32


def _prep_params(params):
    w1, b1, w2, b2, w3, b3 = params
    w1 = w1.astype(jnp.float32)                       # tiny (4 KiB), feeds the VPU
    b1 = b1.reshape(1, -1).astype(jnp.float32)
    w2 = w2.astype(jnp.bfloat16)                      # 128 KiB instead of 256 KiB
    b2 = b2.reshape(1, -1).astype(jnp.float32)
    # Lane-dense head: pad [256,2] -> [256,128]; mask padded logits via the bias.
    w3p = jnp.zeros((w3.shape[0], LANE_PAD), jnp.bfloat16)
    w3p = w3p.at[:, :ACTION_NUMBER].set(w3.astype(jnp.bfloat16))
    b3p = jnp.full((1, LANE_PAD), NEG_BIG, jnp.float32)
    b3p = b3p.at[:, :ACTION_NUMBER].set(b3.astype(jnp.float32))
    return w1, b1, w2, b2, w3p, b3p


def actor_forward_batched(xs, params, *, block_b=128):
    """xs: [B, 4] f32 (each row an independent state) -> [B, 2] action probs."""
    B = xs.shape[0]
    tb = block_b if (B % block_b == 0) else B
    w1, b1, w2, b2, w3p, b3p = _prep_params(params)
    xs = xs.astype(jnp.float32)

    const = lambda i: (0, 0)  # weights: same block every step -> resident in VMEM
    out = pl.pallas_call(
        _actor_kernel,
        out_shape=jax.ShapeDtypeStruct((B, LANE_PAD), jnp.float32),
        grid=(B // tb,),
        in_specs=[
            pl.BlockSpec((tb, STATE_NUMBER), lambda i: (i, 0)),
            pl.BlockSpec(w1.shape, const),
            pl.BlockSpec(b1.shape, const),
            pl.BlockSpec(w2.shape, const),
            pl.BlockSpec(b2.shape, const),
            pl.BlockSpec(w3p.shape, const),
            pl.BlockSpec(b3p.shape, const),
        ],
        out_specs=pl.BlockSpec((tb, LANE_PAD), lambda i: (i, 0)),
        compiler_params=pltpu.CompilerParams(
            dimension_semantics=("parallel",)),  # v7x: shard batch across both TCs
    )(xs, w1, b1, w2, b2, w3p, b3p)
    return out[:, :ACTION_NUMBER]


def actor_forward(x, params):
    """Original forward semantics: a single [4] state -> [2] action probabilities."""
    return actor_forward_batched(x.reshape(1, STATE_NUMBER), params, block_b=1)[0]


def _linear_init(key, fan_in, fan_out):
    """Deterministic stand-in for torch.nn.Linear default init (U[-1/sqrt(fan_in), ...])."""
    bound = 1.0 / math.sqrt(fan_in)
    kw, kb = jax.random.split(key)
    # Stored as [in, out] so the kernel does x @ W.
    w = jax.random.uniform(kw, (fan_in, fan_out), jnp.float32, -bound, bound)
    b = jax.random.uniform(kb, (fan_out,), jnp.float32, -bound, bound)
    return w, b


def init_params(key):
    keys = jax.random.split(key, 7)
    # Actor: 4 -> 256 -> 256 -> 2
    w1, b1 = _linear_init(keys[0], STATE_NUMBER, ACTOR_HIDDEN[0])
    w2, b2 = _linear_init(keys[1], ACTOR_HIDDEN[0], ACTOR_HIDDEN[1])
    w3, b3 = _linear_init(keys[2], ACTOR_HIDDEN[1], ACTION_NUMBER)
    actor = (w1, b1, w2, b2, w3, b3)
    # Critic: 4 -> 256 -> 256 -> 256 -> 1 (built like __init__, unused in forward)
    cw1, cb1 = _linear_init(keys[3], STATE_NUMBER, CRITIC_HIDDEN[0])
    cw2, cb2 = _linear_init(keys[4], CRITIC_HIDDEN[0], CRITIC_HIDDEN[1])
    cw3, cb3 = _linear_init(keys[5], CRITIC_HIDDEN[1], CRITIC_HIDDEN[2])
    cw4, cb4 = _linear_init(keys[6], CRITIC_HIDDEN[2], 1)
    critic = (cw1, cb1, cw2, cb2, cw3, cb3, cw4, cb4)
    return actor, critic


def actor_forward_ref_f32(xs, params):
    """Pure-f32 reference (== torch forward applied to each row independently)."""
    w1, b1, w2, b2, w3, b3 = params
    h1 = jnp.maximum(xs @ w1 + b1, 0.0)
    h2 = jnp.maximum(h1 @ w2 + b2, 0.0)
    logits = h2 @ w3 + b3
    return jax.nn.softmax(logits, axis=-1)


def actor_forward_ref_bf16(xs, params):
    """Reference that mirrors the kernel's bf16-input / f32-accumulate matmuls."""
    w1, b1, w2, b2, w3, b3 = params
    h1 = jnp.maximum(xs @ w1 + b1, 0.0)
    h2 = jnp.dot(h1.astype(jnp.bfloat16), w2.astype(jnp.bfloat16),
                 preferred_element_type=jnp.float32) + b2
    h2 = jnp.maximum(h2, 0.0)
    logits = jnp.dot(h2.astype(jnp.bfloat16), w3.astype(jnp.bfloat16),
                     preferred_element_type=jnp.float32) + b3
    return jax.nn.softmax(logits, axis=-1)


if __name__ == "__main__":
    key = jax.random.PRNGKey(0)
    k_param, k_x = jax.random.split(key)
    actor_params, _critic_params = init_params(k_param)

    # A small rollout of CartPole-like 4-dim states, batched through the kernel.
    B = 256
    xs = jax.random.normal(k_x, (B, STATE_NUMBER), jnp.float32)

    probs = actor_forward_batched(xs, actor_params, block_b=128)
    probs = jax.block_until_ready(probs)

    ref_bf16 = actor_forward_ref_bf16(xs, actor_params)
    ref_f32 = actor_forward_ref_f32(xs, actor_params)

    assert probs.shape == (B, ACTION_NUMBER)
    assert jnp.allclose(probs, ref_bf16, atol=1e-3, rtol=1e-3)
    assert jnp.allclose(probs, ref_f32, atol=2e-2, rtol=2e-2)      # bf16 weight error
    assert jnp.allclose(jnp.sum(probs, axis=-1), 1.0, atol=1e-5)

    # Single-state path (the literal original forward: x is a [4] state vector).
    p1 = actor_forward(xs[0], actor_params)
    p1 = jax.block_until_ready(p1)
    assert p1.shape == (ACTION_NUMBER,)
    assert jnp.allclose(p1, probs[0], atol=1e-3, rtol=1e-3)

    print("KERNEL_OK")
</pallas_src>

<mosaic_0001>
module attributes {stable_mosaic.version = 11 : i64} {
  func.func @_actor_kernel(%arg0: i32, %arg1: memref<128x4xf32, #tpu.memory_space<vmem>>, %arg2: memref<4x256xf32, #tpu.memory_space<vmem>>, %arg3: memref<1x256xf32, #tpu.memory_space<vmem>>, %arg4: memref<256x256xbf16, #tpu.memory_space<vmem>>, %arg5: memref<1x256xf32, #tpu.memory_space<vmem>>, %arg6: memref<256x128xbf16, #tpu.memory_space<vmem>>, %arg7: memref<1x128xf32, #tpu.memory_space<vmem>>, %arg8: memref<128x128xf32, #tpu.memory_space<vmem>>) attributes {dimension_semantics = [#tpu.dimension_semantics<parallel>], iteration_bounds = array<i64: 2>, scalar_prefetch = 0 : i64, scratch_operands = 0 : i64, tpu.core_type = #tpu.core_type<tc>, window_params = [{transform_indices = @transform_0, window_bounds = array<i64: 128, 4>}, {pipeline_mode = #tpu.pipeline_mode<synchronous>, transform_indices = @transform_1, window_bounds = array<i64: 4, 256>}, {pipeline_mode = #tpu.pipeline_mode<synchronous>, transform_indices = @transform_2, window_bounds = array<i64: 1, 256>}, {pipeline_mode = #tpu.pipeline_mode<synchronous>, transform_indices = @transform_3, window_bounds = array<i64: 256, 256>}, {pipeline_mode = #tpu.pipeline_mode<synchronous>, transform_indices = @transform_4, window_bounds = array<i64: 1, 256>}, {pipeline_mode = #tpu.pipeline_mode<synchronous>, transform_indices = @transform_5, window_bounds = array<i64: 256, 128>}, {pipeline_mode = #tpu.pipeline_mode<synchronous>, transform_indices = @transform_6, window_bounds = array<i64: 1, 128>}, {transform_indices = @transform_7, window_bounds = array<i64: 128, 128>}]} {
    %c0 = arith.constant 0 : index
    %c0_0 = arith.constant 0 : index
    %0 = vector.load %arg1[%c0, %c0_0] : memref<128x4xf32, #tpu.memory_space<vmem>>, vector<128x4xf32>
    %c0_1 = arith.constant 0 : index
    %c0_2 = arith.constant 0 : index
    %1 = vector.load %arg2[%c0_1, %c0_2] : memref<4x256xf32, #tpu.memory_space<vmem>>, vector<4x256xf32>
    %c0_3 = arith.constant 0 : index
    %c0_4 = arith.constant 0 : index
    %2 = vector.load %arg3[%c0_3, %c0_4] : memref<1x256xf32, #tpu.memory_space<vmem>>, vector<1x256xf32>
    %3 = vector.extract_strided_slice %0 {offsets = [0, 0], sizes = [128, 1], strides = [1, 1]} : vector<128x4xf32> to vector<128x1xf32>
    %4 = vector.extract_strided_slice %1 {offsets = [0, 0], sizes = [1, 256], strides = [1, 1]} : vector<4x256xf32> to vector<1x256xf32>
    %5 = vector.broadcast %3 : vector<128x1xf32> to vector<128x256xf32>
    %6 = vector.broadcast %4 : vector<1x256xf32> to vector<128x256xf32>
    %7 = arith.mulf %5, %6 : vector<128x256xf32>
    %8 = vector.broadcast %2 : vector<1x256xf32> to vector<128x256xf32>
    %9 = arith.addf %8, %7 : vector<128x256xf32>
    %10 = vector.extract_strided_slice %0 {offsets = [0, 1], sizes = [128, 1], strides = [1, 1]} : vector<128x4xf32> to vector<128x1xf32>
    %11 = vector.extract_strided_slice %1 {offsets = [1, 0], sizes = [1, 256], strides = [1, 1]} : vector<4x256xf32> to vector<1x256xf32>
    %12 = vector.broadcast %10 : vector<128x1xf32> to vector<128x256xf32>
    %13 = vector.broadcast %11 : vector<1x256xf32> to vector<128x256xf32>
    %14 = arith.mulf %12, %13 : vector<128x256xf32>
    %15 = arith.addf %9, %14 : vector<128x256xf32>
    %16 = vector.extract_strided_slice %0 {offsets = [0, 2], sizes = [128, 1], strides = [1, 1]} : vector<128x4xf32> to vector<128x1xf32>
    %17 = vector.extract_strided_slice %1 {offsets = [2, 0], sizes = [1, 256], strides = [1, 1]} : vector<4x256xf32> to vector<1x256xf32>
    %18 = vector.broadcast %16 : vector<128x1xf32> to vector<128x256xf32>
    %19 = vector.broadcast %17 : vector<1x256xf32> to vector<128x256xf32>
    %20 = arith.mulf %18, %19 : vector<128x256xf32>
    %21 = arith.addf %15, %20 : vector<128x256xf32>
    %22 = vector.extract_strided_slice %0 {offsets = [0, 3], sizes = [128, 1], strides = [1, 1]} : vector<128x4xf32> to vector<128x1xf32>
    %23 = vector.extract_strided_slice %1 {offsets = [3, 0], sizes = [1, 256], strides = [1, 1]} : vector<4x256xf32> to vector<1x256xf32>
    %24 = vector.broadcast %22 : vector<128x1xf32> to vector<128x256xf32>
    %25 = vector.broadcast %23 : vector<1x256xf32> to vector<128x256xf32>
    %26 = arith.mulf %24, %25 : vector<128x256xf32>
    %27 = arith.addf %21, %26 : vector<128x256xf32>
    %cst = arith.constant 0.000000e+00 : f32
    %28 = vector.broadcast %cst : f32 to vector<128x256xf32>
    %29 = arith.maximumf %27, %28 : vector<128x256xf32>
    %30 = arith.truncf %29 : vector<128x256xf32> to vector<128x256xbf16>
    %c0_5 = arith.constant 0 : index
    %c0_6 = arith.constant 0 : index
    %31 = vector.load %arg4[%c0_5, %c0_6] : memref<256x256xbf16, #tpu.memory_space<vmem>>, vector<256x256xbf16>
    %cst_7 = arith.constant dense<0.000000e+00> : vector<128x256xf32>
    %32 = tpu.matmul %30, %31, %cst_7 {dimension_numbers = #tpu.dot_dimension_numbers<[1], [0], [0], [1], [0, 0, 1, 1], [], []>} : vector<128x256xbf16>, vector<256x256xbf16>, vector<128x256xf32> -> vector<128x256xf32>
    %c0_8 = arith.constant 0 : index
    %c0_9 = arith.constant 0 : index
    %33 = vector.load %arg5[%c0_8, %c0_9] : memref<1x256xf32, #tpu.memory_space<vmem>>, vector<1x256xf32>
    %34 = vector.broadcast %33 : vector<1x256xf32> to vector<128x256xf32>
    %35 = arith.addf %32, %34 : vector<128x256xf32>
    %cst_10 = arith.constant 0.000000e+00 : f32
    %36 = vector.broadcast %cst_10 : f32 to vector<128x256xf32>
    %37 = arith.maximumf %35, %36 : vector<128x256xf32>
    %38 = arith.truncf %37 : vector<128x256xf32> to vector<128x256xbf16>
    %c0_11 = arith.constant 0 : index
    %c0_12 = arith.constant 0 : index
    %39 = vector.load %arg6[%c0_11, %c0_12] : memref<256x128xbf16, #tpu.memory_space<vmem>>, vector<256x128xbf16>
    %cst_13 = arith.constant dense<0.000000e+00> : vector<128x128xf32>
    %40 = tpu.matmul %38, %39, %cst_13 {dimension_numbers = #tpu.dot_dimension_numbers<[1], [0], [0], [1], [0, 0, 1, 1], [], []>} : vector<128x256xbf16>, vector<256x128xbf16>, vector<128x128xf32> -> vector<128x128xf32>
    %c0_14 = arith.constant 0 : index
    %c0_15 = arith.constant 0 : index
    %41 = vector.load %arg7[%c0_14, %c0_15] : memref<1x128xf32, #tpu.memory_space<vmem>>, vector<1x128xf32>
    %42 = vector.broadcast %41 : vector<1x128xf32> to vector<128x128xf32>
    %43 = arith.addf %40, %42 : vector<128x128xf32>
    %cst_16 = arith.constant dense<0xFF800000> : vector<128xf32>
    %44 = vector.multi_reduction <maximumf>, %43, %cst_16 [1] : vector<128x128xf32> to vector<128xf32>
    %45 = vector.shape_cast %44 : vector<128xf32> to vector<128x1xf32>
    %46 = vector.broadcast %45 : vector<128x1xf32> to vector<128x128xf32>
    %47 = arith.subf %43, %46 : vector<128x128xf32>
    %48 = math.exp %47 : vector<128x128xf32>
    %cst_17 = arith.constant dense<0.000000e+00> : vector<128xf32>
    %49 = vector.multi_reduction <add>, %48, %cst_17 [1] : vector<128x128xf32> to vector<128xf32>
    %50 = vector.shape_cast %49 : vector<128xf32> to vector<128x1xf32>
    %51 = vector.broadcast %50 : vector<128x1xf32> to vector<128x128xf32>
    %52 = arith.divf %48, %51 : vector<128x128xf32>
    %c0_18 = arith.constant 0 : index
    %c0_19 = arith.constant 0 : index
    %53 = vector.load %arg8[%c0_18, %c0_19] : memref<128x128xf32, #tpu.memory_space<vmem>>, vector<128x128xf32>
    tpu.vector_store %arg8[%c0_18, %c0_19], %52 {strides = array<i32>} : memref<128x128xf32, #tpu.memory_space<vmem>>, vector<128x128xf32>,
    return
  }
  func.func @transform_0(%arg0: i32) -> (i32, i32) {
    %c0_i32 = arith.constant 0 : i32
    %c0_i32_0 = arith.constant 0 : i32
    return %arg0, %c0_i32 : i32, i32
  }
  func.func @transform_1(%arg0: i32) -> (i32, i32) {
    %c0_i32 = arith.constant 0 : i32
    %c0_i32_0 = arith.constant 0 : i32
    %c0_i32_1 = arith.constant 0 : i32
    return %c0_i32, %c0_i32_0 : i32, i32
  }
  func.func @transform_2(%arg0: i32) -> (i32, i32) {
    %c0_i32 = arith.constant 0 : i32
    %c0_i32_0 = arith.constant 0 : i32
    %c0_i32_1 = arith.constant 0 : i32
    return %c0_i32, %c0_i32_0 : i32, i32
  }
  func.func @transform_3(%arg0: i32) -> (i32, i32) {
    %c0_i32 = arith.constant 0 : i32
    %c0_i32_0 = arith.constant 0 : i32
    %c0_i32_1 = arith.constant 0 : i32
    return %c0_i32, %c0_i32_0 : i32, i32
  }
  func.func @transform_4(%arg0: i32) -> (i32, i32) {
    %c0_i32 = arith.constant 0 : i32
    %c0_i32_0 = arith.constant 0 : i32
    %c0_i32_1 = arith.constant 0 : i32
    return %c0_i32, %c0_i32_0 : i32, i32
  }
  func.func @transform_5(%arg0: i32) -> (i32, i32) {
    %c0_i32 = arith.constant 0 : i32
    %c0_i32_0 = arith.constant 0 : i32
    %c0_i32_1 = arith.constant 0 : i32
    return %c0_i32, %c0_i32_0 : i32, i32
  }
  func.func @transform_6(%arg0: i32) -> (i32, i32) {
    %c0_i32 = arith.constant 0 : i32
    %c0_i32_0 = arith.constant 0 : i32
    %c0_i32_1 = arith.constant 0 : i32
    return %c0_i32, %c0_i32_0 : i32, i32
  }
  func.func @transform_7(%arg0: i32) -> (i32, i32) {
    %c0_i32 = arith.constant 0 : i32
    %c0_i32_0 = arith.constant 0 : i32
    return %arg0, %c0_i32 : i32, i32
  }
}

</mosaic_0001>

<bundles_post_ra>
// kernel: tpu_custom_call.1
= control target key start
LH: loop header
LB: loop body
LE: loop exit
PB: predicated region body
PF: predicated region fallthrough
CT: control target
= control target key end

     0   :  { %12 = vsyncpa [#allocation3], 0  ;;  %s3661_s0 = inlined_call_operand.vmem [shape: f32[256,4], index: 0, kind: input, shape index: {}]   ;;  %s3662_s1 = inlined_call_operand.vmem [shape: f32[4,256], index: 1, kind: input, shape index: {}]   ;;  %s3663_s2 = inlined_call_operand.vmem [shape: f32[1,256], index: 2, kind: input, shape index: {}]   ;;  %s3664_s3 = inlined_call_operand.vmem [shape: bf16[256,256], index: 3, kind: input, shape index: {}]   ;;  %s3665_s4 = inlined_call_operand.hbm [shape: f32[1,256], index: 4, kind: input, shape index: {}]   ;;  %s3666_s5 = inlined_call_operand.hbm [shape: bf16[256,128], index: 5, kind: input, shape index: {}]   ;;  %s3667_s6 = inlined_call_operand.vmem [shape: f32[1,128], index: 6, kind: input, shape index: {}]   ;;  %s3668_s7 = inlined_call_operand.hbm [shape: f32[256,128], index: 7, kind: output, shape index: {}]  }
   0x1   :  { %13 = vsyncpa [#allocation6], 0 }
   0x2   :  { %14 = vsyncpa [#allocation4], 0 }
   0x3   :  { %16 = vsyncpa [#allocation4 + $0x1], 0  ;;  %s2722_s24 = smov 0   ;;  %s2724_s25 = smov 0  }
   0x4   :  { %s2726_s26 = smov 0   ;;  %s2728_s27 = smov 0  }
   0x5 LB: > { %s2743_s28 = sadd.s32 4294967295, %s2670_s27   ;;  %s2076_s29 = sadd.s32 4294967294, %s2670_s27   ;;  %s2670_s27 = sphi %s2728_s27, %s3675_s27   ;;  %s2666_s26 = sphi %s2726_s26, %s3674_s26   ;;  %s2662_s25 = sphi %s2724_s25, %s3673_s25   ;;  %s2658_s24 = sphi %s2722_s24, %s3672_s24  }
   0x6   : > { %s2747_s30 = sadd.s32 1, %s2670_s27   ;;  %s181_s8 = sadd.s32 1, %s2666_s26 }
   0x7   : > { %s178_s9 = ssub.s32 %s2670_s27, %s2747_s30  ;;  %p191_p0 = scmp.ne.s32.totalorder %s2666_s26, %s2662_s25 }
   0x8   : > { %p179_p1 = scmp.eq.s32.totalorder %s178_s9, 0  ;;  %p192_p2 = scmp.eq.s32.totalorder %s2743_s28, 1 }
   0x9   : > { %p197_p3 = scmp.ne.s32.totalorder %s2662_s25, %s2658_s24  ;;  %p198_p4 = scmp.eq.s32.totalorder %s2076_s29, 1 }
   0xa   : > { %s2758_s10 = scalar_select %p179_p1, %s2666_s26, %s181_s8  }
   0xb   : > { %p2760_p5 = por %p192_p2, %p191_p0  ;;  %p2764_p6 = por %p198_p4, %p197_p3 }
   0xc   : > { %p2077_p7 = scmp.ge.s32.totalorder %s2670_s27, 1  ;;  %p205_p8 = scmp.lt.s32.totalorder %s2670_s27, 3 }
   0xd   : > { %p2370_p9 = scmp.eq.s32.totalorder %s2743_s28, 0  ;;  %s226_s16 = sshll.u32 %s3665_s4, 4  ;;  %s227_s16 = int_to_ptr.hbm [resolvable:$true] %s226_s16 }
   0xe   : > { %p2771_p10 = pnand %p2077_p7, %p205_p8  ;;  %s2672_s17 = smov [#allocation2]  }
   0xf   : > { %s228_s18 = sshll.u32 %s2672_s17, 4  ;;  %s237_s21 = sshll.u32 %s3666_s5, 4  ;;  %s229_s18 = int_to_ptr.vmem [resolvable:$true] %s228_s18  ;;  %s238_s21 = int_to_ptr.hbm [resolvable:$true] %s237_s21 }
  0x10   : > { %p2359_p11 = pneg %p2771_p10  ;;  %s2673_s22 = smov [#allocation5]  }
  0x11   : > { %s239_s23 = sshll.u32 %s2673_s22, 4  ;;  %s2674_s29 = smov 64   ;;  %s240_s23 = int_to_ptr.vmem [resolvable:$true] %s239_s23 }
  0x12   : > { %p2360_p12 = pnand %p2370_p9, %p2359_p11  ;;  %s2675_s8 = smov 4  }
  0x13   : > { %267 = sbr.rel (%p2771_p10) target bundleno = 988 (0x3dc), region = 48 }
  0x14   : > { %2362 = dma.hbm_to_vmem [thread:$0]  (!%p2360_p12), %s227_s16, 32, %s229_s18, [#allocation3]  }
  0x15   : > { %2365 = dma.hbm_to_vmem [thread:$0]  (!%p2360_p12), %s238_s21, 2048, %s240_s23, [#allocation6], %s2674_s29, %s2674_s29, %s2675_s8  }
  0x18   : > { %2645 = dma.done.wait (%p2370_p9), [#allocation3], 32  }
  0x19   : > { %2647 = vsyncadd (%p2370_p9), [#allocation3], 4294967264 }
  0x1a   : > { %2649 = dma.done.wait (%p2370_p9), [#allocation6], 2048  }
  0x1b   : > { %2651 = vsyncadd (%p2370_p9), [#allocation6], 4294965248  ;;  %s2085_s9 = sshll.u32 %s2743_s28, 4  ;;  %v2676_v0 = vmov 1   ;;  %v2677_v1 = vmov 0   ;;  %v2678_v2 = vmov 2  }
  0x1c   : > { %2418 = vset.pattern.permute.xlu1 %v2676_v0  ;;  %2417 = vset.pattern.permute.xlu0 %v2677_v1  ;;  %p306_p13 = scmp.lt.s32.totalorder %s2085_s9, 31  ;;  %v2679_v7 = vmov 3   ;;  %v2145_v14 = vld [vmem:[%s3664_s3 + $0x70] sm:$0xf]  ;;  %v2299_v15 = vld [vmem:[%s3664_s3 + $0x74] sm:$0xf0] }
  0x1d   : > { %2419 = vset.pattern.permute.xlu2 %v2678_v2  ;;  %v2209_v16 = vld [vmem:[%s3664_s3 + $0xf0] sm:$0xf]  ;;  %v2146_v17 = vor.u32 %v2299_v15, %v2145_v14  ;;  %v2315_v18 = vld [vmem:[%s3664_s3 + $0xf4] sm:$0xf0]  ;;  %v2137_v21 = vld [vmem:[%s3664_s3 + $0x60] sm:$0xf] }
  0x1e   : > { %s3677_s9 = smov (!%p306_p13, %s2085_s9), 31  ;;  %v2210_v20 = vor.u32 %v2315_v18, %v2209_v16  ;;  %v2297_v22 = vld [vmem:[%s3664_s3 + $0x64] sm:$0xf0]  ;;  %v2201_v23 = vld [vmem:[%s3664_s3 + $0xe0] sm:$0xf]  ;;  %s302_s15 = sand.u32 1, %s2662_s25  }
  0x1f   : > { %s2086_s13 = sshll.u32 %s3677_s9, 3  ;;  %2333 = vmatpush.bf16.msra.mxu2 %v2146_v17  ;;  %1134 = vmatpush.bf16.msra.mxu0 %v2146_v17  ;;  %v2138_v24 = vor.u32 %v2297_v22, %v2137_v21  ;;  %v2313_v25 = vld [vmem:[%s3664_s3 + $0xe4] sm:$0xf0]  ;;  %v2129_v28 = vld [vmem:[%s3664_s3 + $0x50] sm:$0xf]  ;;  %v328_v16 = vld [vmem:[%s3662_s1] sm:$0xff] }
  0x20   : > { %s2802_s16 = scalar_lea.vmem %s3661_s0, %s2086_s13  ;;  %2341 = vmatpush.bf16.msra.mxu3 %v2210_v20  ;;  %1183 = vmatpush.bf16.msra.mxu1 %v2210_v20  ;;  %v2202_v26 = vor.u32 %v2313_v25, %v2201_v23  ;;  %v2295_v29 = vld [vmem:[%s3664_s3 + $0x54] sm:$0xf0]  ;;  %v2193_v30 = vld [vmem:[%s3664_s3 + $0xd0] sm:$0xf]  ;;  %v2121_v36 = vld [vmem:[%s3664_s3 + $0x40] sm:$0xf] }
  0x21   : > { %v320_v3 = vld [vmem:[%s2802_s16 + $0x40] sm:$0xff]  ;;  %v321_v4 = vld [vmem:[%s2802_s16 + $0x48] sm:$0xff]  ;;  %v322_v6 = vld [vmem:[%s2802_s16 + $0x50] sm:$0xff]  ;;  %v2130_v32 = vor.u32 %v2295_v29, %v2129_v28  ;;  %v411_v17 = vperm.slane %v328_v16, 0  ;;  %v412_v18 = vperm.slane %v328_v16, 4  ;;  %v551_v28 = vperm.slane %v328_v16, 5 }
  0x22   : > { %519 = vperm.xlu1 %2418, %v320_v3   ;;  %372 = vperm.xlu0 %2417, %v320_v3   ;;  %v324_v5 = vld [vmem:[%s2802_s16 + $0x60] sm:$0xff]  ;;  %v323_v8 = vld [vmem:[%s2802_s16 + $0x58] sm:$0xff]  ;;  %v326_v9 = vld [vmem:[%s2802_s16 + $0x70] sm:$0xff]  ;;  %v684_v29 = vperm.slane %v328_v16, 2  ;;  %s2084_s17 = sshll.u32 %s302_s15, 7  ;;  %s2332_s19 = sshll.u32 %s2743_s28, 7 }
  0x23   : > { %653 = vperm.xlu2 %2419, %v320_v3   ;;  %v327_v10 = vld [vmem:[%s2802_s16 + $0x78] sm:$0xff]  ;;  %v325_v11 = vld [vmem:[%s2802_s16 + $0x68] sm:$0xff]  ;;  %v2830_v12 = vld [vmem:[%s2802_s16] sm:$0xff]  ;;  %2334 = vmatpush.bf16.msra.mxu2 %v2138_v24  ;;  %v2994_v22 = vperm.slane %v411_v17, 0  ;;  %v2996_v23 = vperm.slane %v412_v18, 0  ;;  %s3593_s18 = scalar_lea.vmem [#allocation7], %s2084_s17  ;;  %s1988_s21 = scalar_lea.hbm %s3668_s7, %s2332_s19 }
  0x24   : > { %v2869_v27 = vld [vmem:[%s2802_s16 + $0x8] sm:$0xff]  ;;  %2342 = vmatpush.bf16.msra.mxu3 %v2202_v26  ;;  %v2885_v31 = vld [vmem:[%s2802_s16 + $0x18] sm:$0xff]  ;;  %1135 = vmatpush.bf16.msra.mxu0 %v2138_v24  ;;  %v2185_v38 = vld [vmem:[%s3664_s3 + $0xc0] sm:$0xf]  ;;  %s1989_s22 = sshll.u32 %s3593_s18, 4  ;;  %s1991_s23 = sshll.u32 %s1988_s21, 4  ;;  %s1990_s22 = int_to_ptr.vmem [resolvable:$true] %s1989_s22  ;;  %s1992_s23 = int_to_ptr.hbm [resolvable:$true] %s1991_s23 }
  0x25   : > { %v2311_v33 = vld [vmem:[%s3664_s3 + $0xd4] sm:$0xf0]  ;;  %1184 = vmatpush.bf16.msra.mxu1 %v2202_v26  ;;  %v2293_v37 = vld [vmem:[%s3664_s3 + $0x44] sm:$0xf0]  ;;  %v2113_v44 = vld [vmem:[%s3664_s3 + $0x30] sm:$0xf] }
  0x26   : > { %v2194_v34 = vor.u32 %v2311_v33, %v2193_v30  ;;  %v2122_v39 = vor.u32 %v2293_v37, %v2121_v36  ;;  %v2309_v40 = vld [vmem:[%s3664_s3 + $0xc4] sm:$0xf0]  ;;  %v2291_v45 = vld [vmem:[%s3664_s3 + $0x34] sm:$0xf0]  ;;  %v2177_v46 = vld [vmem:[%s3664_s3 + $0xb0] sm:$0xf] }
  0x27   : > { %2335 = vmatpush.bf16.msra.mxu2 %v2130_v32  ;;  %v2186_v41 = vor.u32 %v2309_v40, %v2185_v38  ;;  %v2114_v47 = vor.u32 %v2291_v45, %v2113_v44  ;;  %v2307_v48 = vld [vmem:[%s3664_s3 + $0xb4] sm:$0xf0]  ;;  %v2926_v50 = vld [vmem:[%s2802_s16 + $0x10] sm:$0xff]  ;;  %v2105_v51 = vld [vmem:[%s3664_s3 + $0x20] sm:$0xf]  ;;  %v685_v30 = vperm.slane %v328_v16, 6 }
  0x28   : > { %2343 = vmatpush.bf16.msra.mxu3 %v2194_v34  ;;  %1136 = vmatpush.bf16.msra.mxu0 %v2130_v32  ;;  %v2178_v49 = vor.u32 %v2307_v48, %v2177_v46  ;;  %v2289_v52 = vld [vmem:[%s3664_s3 + $0x24] sm:$0xf0]  ;;  %v2169_v53 = vld [vmem:[%s3664_s3 + $0xa0] sm:$0xf]  ;;  %v2097_v60 = vld [vmem:[%s3664_s3 + $0x10] sm:$0xf] }
  0x29   : > { %1185 = vmatpush.bf16.msra.mxu1 %v2194_v34  ;;  %v2106_v54 = vor.u32 %v2289_v52, %v2105_v51  ;;  %v2305_v55 = vld [vmem:[%s3664_s3 + $0xa4] sm:$0xf0]  ;;  %v2287_v61 = vld [vmem:[%s3664_s3 + $0x14] sm:$0xf0]  ;;  %v2161_v62 = vld [vmem:[%s3664_s3 + $0x90] sm:$0xf] }
  0x2a   : > { %523 = vperm.xlu1 %2418, %v321_v4   ;;  %377 = vperm.xlu0 %2417, %v321_v4   ;;  %v2170_v59 = vor.u32 %v2305_v55, %v2169_v53  ;;  %v2098_v63 = vor.u32 %v2287_v61, %v2097_v60  ;;  %v2989_v20 = vld [vmem:[%s2802_s16 + $0x28] sm:$0xff]  ;;  %v329_v25 = vld [vmem:[%s3663_s2] sm:$0x3]  ;;  %v819_v40 = vperm.slane %v328_v16, 7  ;;  %v3019_v44 = vperm.slane %v551_v28, 1  ;;  %s1977_s28 = scalar_lea.sflag [#allocation4], %s302_s15 }
  0x2b   : > { %657 = vperm.xlu2 %2419, %v321_v4   ;;  %2336 = vmatpush.bf16.msra.mxu2 %v2122_v39  ;;  %v3008_v34 = vperm.slane %v329_v25, 0  ;;  %v3010_v36 = vperm.slane %v329_v25, 1  ;;  %v3026_v48 = vperm.slane %v684_v29, 2  ;;  %s2614_s29 = sshra.s32 %s1992_s23, 4  ;;  %s2620_s14 = scalar_lea.hbm %s3668_s7, 256  ;;  %s2615_s29 = int_to_ptr.hbm [resolvable:$true] %s2614_s29 }
  0x2c   : > { %2344 = vmatpush.bf16.msra.mxu3 %v2186_v41  ;;  %1137 = vmatpush.bf16.msra.mxu0 %v2122_v39  ;;  %v818_v39 = vperm.slane %v328_v16, 3  ;;  %v3038_v55 = vperm.slane %v819_v40, 3  ;;  %s2616_s8 = scalar_lea.hbm %s2615_s29, 128  ;;  %p2621_p3 = scmp.lt.s32.totalorder %s2615_s29, %s3668_s7 }
  0x2d   : > { %1186 = vmatpush.bf16.msra.mxu1 %v2186_v41  ;;  %p2617_p0 = scmp.ne.s32.totalorder %s2615_s29, %s2616_s8  ;;  %p2622_p4 = scmp.lt.s32.totalorder %s2620_s14, %s2616_s8 }
  0x2f   : > { %2337 = vmatpush.bf16.msra.mxu2 %v2114_v47  ;;  %p2618_p1 = pnand %p2617_p0, %p2760_p5  ;;  %p2623_p7 = por %p2622_p4, %p2621_p3 }
  0x30   : > { %2345 = vmatpush.bf16.msra.mxu3 %v2178_v49  ;;  %1138 = vmatpush.bf16.msra.mxu0 %v2114_v47 }
  0x31   : > { %1187 = vmatpush.bf16.msra.mxu1 %v2178_v49  ;;  %v3028_v49 = vperm.slane %v685_v30, 2  ;;  %p2619_p2 = pneg %p2618_p1 }
  0x32   : > { %2420 = vset.pattern.permute.xlu1 %v2679_v7  ;;  %392 = vperm.xlu0 %2417, %v324_v5  }
  0x33   : > { %791 = vperm.xlu1 %2420, %v321_v4   ;;  %2421 = vset.pattern.permute.xlu2 %v2677_v1  ;;  %p2624_p8 = pnand %p2623_p7, %p2619_p2 }
  0x34   : > { %382 = vperm.xlu2 %2421, %v322_v6   ;;  %2338 = vmatpush.bf16.msra.mxu2 %v2106_v54 }
  0x35   : > { %2346 = vmatpush.bf16.msra.mxu3 %v2170_v59  ;;  %1139 = vmatpush.bf16.msra.mxu0 %v2106_v54  ;;  %v3036_v54 = vperm.slane %v818_v39, 3 }
  0x36   : > { %1188 = vmatpush.bf16.msra.mxu1 %v2170_v59 }
  0x38   : > { %2339 = vmatpush.bf16.msra.mxu2 %v2098_v63 }
  0x39   : > { %1140 = vmatpush.bf16.msra.mxu0 %v2098_v63 }
  0x3a   : > { %2428 = vset.pattern.permute.xlu0 %v2676_v0 }
  0x3b   : > { %2422 = vset.pattern.permute.xlu1 %v2677_v1  ;;  %531 = vperm.xlu0 %2428, %v323_v8  }
  0x3c   : > { %387 = vperm.xlu1 %2422, %v323_v8   ;;  %2423 = vset.pattern.permute.xlu2 %v2676_v0 }
  0x3d   : > { %527 = vperm.xlu2 %2423, %v322_v6  }
  0x43   : > { %543 = vperm.xlu0 %2428, %v326_v9  }
  0x44   : > { %2424 = vset.pattern.permute.xlu1 %v2678_v2 }
  0x45   : > { %661 = vperm.xlu1 %2424, %v322_v6   ;;  %2425 = vset.pattern.permute.xlu2 %v2678_v2 }
  0x46   : > { %665 = vperm.xlu2 %2425, %v323_v8  }
  0x4b   : > { %2437 = vset.pattern.permute.xlu0 %v2679_v7 }
  0x4c   : > { %787 = vperm.xlu0 %2437, %v320_v3   ;;  %v2303_v3 = vld [vmem:[%s3664_s3 + $0x94] sm:$0xf0] }
  0x4d   : > { %2426 = vset.pattern.permute.xlu1 %v2679_v7  ;;  %v2162_v4 = vor.u32 %v2303_v3, %v2161_v62 }
  0x4e   : > { %795 = vperm.xlu1 %2426, %v322_v6   ;;  %2427 = vset.pattern.permute.xlu2 %v2679_v7  ;;  %v2285_v6 = vld [vmem:[%s3664_s3 + $0x4] sm:$0xf0] }
  0x4f   : > { %799 = vperm.xlu2 %2427, %v323_v8   ;;  %2347 = vmatpush.bf16.msra.mxu3 %v2162_v4 }
  0x50   : > { %1189 = vmatpush.bf16.msra.mxu1 %v2162_v4 }
  0x54   : > { %815 = vperm.xlu0 %2437, %v327_v10  }
  0x56   : > { %2429 = vset.pattern.permute.xlu1 %v2677_v1 }
  0x57   : > { %397 = vperm.xlu1 %2429, %v325_v11   ;;  %2430 = vset.pattern.permute.xlu2 %v2676_v0 }
  0x58   : > { %535 = vperm.xlu2 %2430, %v324_v5  }
  0x5c   : > { %2442 = vset.pattern.permute.xlu0 %v2678_v2 }
  0x5d   : > { %673 = vperm.xlu0 %2442, %v325_v11  }
  0x5f   : > { %2431 = vset.pattern.permute.xlu1 %v2676_v0 }
  0x60   : > { %539 = vperm.xlu1 %2431, %v325_v11   ;;  %2432 = vset.pattern.permute.xlu2 %v2678_v2 }
  0x61   : > { %669 = vperm.xlu2 %2432, %v324_v5  }
  0x65   : > { %621 = vperm.xlu0 %2442, %v2830_v12  }
  0x68   : > { %2433 = vset.pattern.permute.xlu1 %v2679_v7 }
  0x69   : > { %803 = vperm.xlu1 %2433, %v324_v5   ;;  %2434 = vset.pattern.permute.xlu2 %v2679_v7  ;;  %v2089_v5 = vld [vmem:[%s3664_s3] sm:$0xf] }
  0x6a   : > { %807 = vperm.xlu2 %2434, %v325_v11   ;;  %v2090_v8 = vor.u32 %v2285_v6, %v2089_v5 }
  0x6c   : > { %2340 = vmatpush.bf16.msra.mxu2 %v2090_v8  ;;  %1141 = vmatpush.bf16.msra.mxu0 %v2090_v8 }
  0x6d   : > { %2451 = vset.pattern.permute.xlu0 %v2677_v1 }
  0x6e   : > { %347 = vperm.xlu0 %2451, %v2885_v31  }
  0x71   : > { %2435 = vset.pattern.permute.xlu1 %v2677_v1 }
  0x72   : > { %402 = vperm.xlu1 %2435, %v326_v9   ;;  %2436 = vset.pattern.permute.xlu2 %v2677_v1 }
  0x73   : > { %407 = vperm.xlu2 %2436, %v327_v10  }
  0x76   : > { %2456 = vset.pattern.permute.xlu0 %v2679_v7 }
  0x77   : > { %763 = vperm.xlu0 %2456, %v2926_v50  }
  0x7a   : > { %2438 = vset.pattern.permute.xlu1 %v2676_v0 }
  0x7b   : > { %547 = vperm.xlu1 %2438, %v327_v10   ;;  %2439 = vset.pattern.permute.xlu2 %v2678_v2 }
  0x7c   : > { %677 = vperm.xlu2 %2439, %v326_v9  }
  0x7d   : > { %v2838_v13 = vpop.permute.xlu2 %653 }
  0x7e   : > { %v706_v8 = vmul.f32 %v3026_v48, %v2838_v13 }
  0x7f   : > { %2461 = vset.pattern.permute.xlu0 %v2676_v0 }
  0x80   : > { %507 = vperm.xlu0 %2461, %v2989_v20  }
  0x83   : > { %2440 = vset.pattern.permute.xlu1 %v2678_v2 }
  0x84   : > { %681 = vperm.xlu1 %2440, %v327_v10   ;;  %2441 = vset.pattern.permute.xlu2 %v2679_v7  ;;  %v2301_v10 = vld [vmem:[%s3664_s3 + $0x84] sm:$0xf0] }
  0x85   : > { %811 = vperm.xlu2 %2441, %v326_v9   ;;  %v2854_v19 = vpop.permute.xlu2 %657  ;;  %v2153_v9 = vld [vmem:[%s3664_s3 + $0x80] sm:$0xf] }
  0x86   : > { %v2154_v15 = vor.u32 %v2301_v10, %v2153_v9  ;;  %v709_v5 = vmul.f32 %v3028_v49, %v2854_v19 }
  0x88   : > { %2348 = vmatpush.bf16.msra.mxu3 %v2154_v15  ;;  %1190 = vmatpush.bf16.msra.mxu1 %v2154_v15 }
  0x89   : > { %2466 = vset.pattern.permute.xlu0 %v2677_v1 }
  0x8c   : > { %2443 = vset.pattern.permute.xlu1 %v2677_v1 }
  0x8d   : > { %332 = vperm.xlu1 %2443, %v2830_v12   ;;  %2444 = vset.pattern.permute.xlu2 %v2677_v1 }
  0x8e   : > { %337 = vperm.xlu2 %2444, %v2869_v27   ;;  %v2891_v35 = vpop.permute.xlu2 %382 }
  0x8f   : > { %v437_v29 = vmul.f32 %v2994_v22, %v2891_v35 }
  0x94   : > { %v2905_v42 = vpop.permute.xlu1 %519  ;;  %v2907_v43 = vpop.permute.xlu0 %372 }
  0x95   : > { %2445 = vset.pattern.permute.xlu1 %v2676_v0  ;;  %v433_v37 = vmul.f32 %v2994_v22, %v2907_v43  ;;  %v434_v38 = vmul.f32 %v2996_v23, %v2907_v43  ;;  %v573_v61 = vmul.f32 %v3019_v44, %v2905_v42 }
  0x96   : > { %487 = vperm.xlu1 %2445, %v2830_v12   ;;  %2446 = vset.pattern.permute.xlu2 %v2676_v0 }
  0x97   : > { %491 = vperm.xlu2 %2446, %v2869_v27   ;;  %v2942_v56 = vpop.permute.xlu2 %527  ;;  %v470_v43 = vadd.f32 %v3008_v34, %v433_v37  ;;  %v471_v51 = vadd.f32 %v3010_v36, %v434_v38 }
  0x99   : > { %v605_v4 = vadd.f32 %v573_v61, %v471_v51 }
  0x9c   : > { %v2944_v57 = vpop.permute.xlu1 %523  ;;  %v378_v58 = vpop.permute.xlu0 %377 }
  0x9d   : > { %v435_v32 = vmul.f32 %v2994_v22, %v378_v58  ;;  %v436_v33 = vmul.f32 %v2996_v23, %v378_v58  ;;  %v575_v53 = vmul.f32 %v3019_v44, %v2944_v57 }
  0x9e   : > { %2447 = vset.pattern.permute.xlu1 %v2678_v2 }
  0x9f   : > { %625 = vperm.xlu1 %2447, %v2869_v27   ;;  %2448 = vset.pattern.permute.xlu2 %v2679_v7  ;;  %v472_v45 = vadd.f32 %v3008_v34, %v435_v32  ;;  %v473_v46 = vadd.f32 %v3010_v36, %v436_v33 }
  0xa0   : > { %755 = vperm.xlu2 %2448, %v2830_v12   ;;  %v2979_v14 = vpop.permute.xlu2 %665 }
  0xa1   : > { %v607_v63 = vadd.f32 %v575_v53, %v473_v46  ;;  %v713_v61 = vmul.f32 %v3028_v49, %v2979_v14 }
  0xa3   : > { %v741_v10 = vadd.f32 %v709_v5, %v607_v63 }
  0xa4   : > { %v2975_v11 = vpop.permute.xlu0 %392 }
  0xa5   : > { %v2977_v12 = vpop.permute.xlu1 %791 }
  0xa6   : > { %v842_v6 = vmul.f32 %v3036_v54, %v2977_v12 }
  0xa7   : > { %2449 = vset.pattern.permute.xlu1 %v2679_v7 }
  0xa8   : > { %759 = vperm.xlu1 %2449, %v2869_v27   ;;  %2450 = vset.pattern.permute.xlu2 %v2677_v1  ;;  %v550_v27 = vperm.slane %v328_v16, 1 }
  0xa9   : > { %342 = vperm.xlu2 %2450, %v2926_v50   ;;  %v3001_v26 = vpop.permute.xlu2 %799 }
  0xaa   : > { %v3017_v41 = vperm.slane %v550_v27, 1 }
  0xac   : > { %v574_v52 = vmul.f32 %v3017_v41, %v2944_v57  ;;  %v572_v60 = vmul.f32 %v3017_v41, %v2905_v42  ;;  %v708_v57 = vmul.f32 %v3026_v48, %v2854_v19  ;;  %v843_v42 = vmul.f32 %v3038_v55, %v2977_v12 }
  0xad   : > { %v2992_v21 = vpop.permute.xlu0 %531 }
  0xae   : > { %v388_v24 = vpop.permute.xlu1 %387  ;;  %v606_v62 = vadd.f32 %v574_v52, %v472_v45  ;;  %v604_v3 = vadd.f32 %v572_v60, %v470_v43  ;;  %v875_v12 = vadd.f32 %v843_v42, %v741_v10  ;;  %v578_v40 = vmul.f32 %v3017_v41, %v2992_v21 }
  0xaf   : > { %v439_v15 = vmul.f32 %v2994_v22, %v388_v24  ;;  %v440_v19 = vmul.f32 %v2996_v23, %v388_v24  ;;  %v3073_v24 = vld [vmem:[%s2802_s16 + $0x20] sm:$0xff]  ;;  %v579_v45 = vmul.f32 %v3019_v44, %v2992_v21  ;;  %v474_v52 = vadd.f32 %v3008_v34, %v437_v29 }
  0xb0   : > { %2452 = vset.pattern.permute.xlu1 %v2676_v0  ;;  %v740_v9 = vadd.f32 %v708_v57, %v606_v62  ;;  %v738_v16 = vadd.f32 %v706_v8, %v604_v3  ;;  %v907_v51 = vmax.f32 %v875_v12, 0.0  ;;  %v576_v60 = vmul.f32 %v3017_v41, %v2942_v56  ;;  %v3100_v3 = vld [vmem:[%s2802_s16 + $0x30] sm:$0xff] }
  0xb1   : > { %495 = vperm.xlu1 %2452, %v2926_v50   ;;  %2453 = vset.pattern.permute.xlu2 %v2676_v0  ;;  %v476_v38 = vadd.f32 %v3008_v34, %v439_v15  ;;  %v477_v39 = vadd.f32 %v3010_v36, %v440_v19  ;;  %v577_v21 = vmul.f32 %v3019_v44, %v2942_v56 }
  0xb2   : > { %499 = vperm.xlu2 %2453, %v2885_v31   ;;  %v3040_v59 = vpop.permute.xlu2 %535  ;;  %v874_v25 = vadd.f32 %v842_v6, %v740_v9  ;;  %362 = vperm.xlu0 %2466, %v3100_v3   ;;  %v846_v9 = vmul.f32 %v3036_v54, %v3001_v26 }
  0xb3   : > { %v611_v57 = vadd.f32 %v579_v45, %v477_v39 }
  0xb4   : > { %v906_v46 = vmax.f32 %v874_v25, 0.0 }
  0xb5   : > { %v3024_v47 = vpop.permute.xlu0 %543  ;;  %v745_v19 = vadd.f32 %v713_v61, %v611_v57 }
  0xb7   : > { %v662_v58 = vpop.permute.xlu1 %661 }
  0xb8   : > { %v710_v5 = vmul.f32 %v3026_v48, %v662_v58  ;;  %v711_v56 = vmul.f32 %v3028_v49, %v662_v58  ;;  %v847_v58 = vmul.f32 %v3038_v55, %v3001_v26  ;;  %v442_v26 = vmul.f32 %v2996_v23, %v2975_v11 }
  0xb9   : > { %2454 = vset.pattern.permute.xlu1 %v2678_v2 }
  0xba   : > { %629 = vperm.xlu1 %2454, %v2926_v50   ;;  %2455 = vset.pattern.permute.xlu2 %v2678_v2  ;;  %v707_v50 = vmul.f32 %v3028_v49, %v2838_v13  ;;  %v438_v13 = vmul.f32 %v2996_v23, %v2891_v35  ;;  %v879_v29 = vadd.f32 %v847_v58, %v745_v19 }
  0xbb   : > { %633 = vperm.xlu2 %2455, %v2885_v31   ;;  %v3070_v37 = vpop.permute.xlu2 %669  ;;  %2471 = vset.pattern.permute.xlu0 %v2678_v2  ;;  %v479_v45 = vadd.f32 %v3010_v36, %v442_v26 }
  0xbc   : > { %v739_v17 = vadd.f32 %v707_v50, %v605_v4  ;;  %v475_v53 = vadd.f32 %v3010_v36, %v438_v13  ;;  %v610_v4 = vadd.f32 %v578_v40, %v476_v38  ;;  %v3124_v13 = vld [vmem:[%s2802_s16 + $0x38] sm:$0xff] }
  0xbd   : > { %649 = vperm.xlu0 %2471, %v3124_v13  }
  0xbe   : > { %v788_v18 = vpop.permute.xlu0 %787  ;;  %v609_v42 = vadd.f32 %v577_v21, %v475_v53  ;;  %v581_v21 = vmul.f32 %v3019_v44, %v3040_v59 }
  0xbf   : > { %v840_v27 = vmul.f32 %v3036_v54, %v788_v18  ;;  %v841_v28 = vmul.f32 %v3038_v55, %v788_v18 }
  0xc0   : > { %v796_v30 = vpop.permute.xlu1 %795 }
  0xc1   : > { %v872_v32 = vadd.f32 %v840_v27, %v738_v16  ;;  %v873_v33 = vadd.f32 %v841_v28, %v739_v17  ;;  %v844_v8 = vmul.f32 %v3036_v54, %v796_v30  ;;  %v845_v50 = vmul.f32 %v3038_v55, %v796_v30 }
  0xc2   : > { %2457 = vset.pattern.permute.xlu1 %v2679_v7  ;;  %v743_v17 = vadd.f32 %v711_v56, %v609_v42  ;;  %v441_v27 = vmul.f32 %v2994_v22, %v2975_v11  ;;  %v580_v11 = vmul.f32 %v3017_v41, %v3040_v59  ;;  %v613_v42 = vadd.f32 %v581_v21, %v479_v45  ;;  %v2296_v45 = vld [vmem:[%s3664_s3 + $0x64] sm:$0xf] }
  0xc3   : > { %767 = vperm.xlu1 %2457, %v2885_v31   ;;  %v904_v35 = vmax.f32 %v872_v32, 0.0  ;;  %v905_v43 = vmax.f32 %v873_v33, 0.0  ;;  %2458 = vset.pattern.permute.xlu2 %v2677_v1  ;;  %v712_v31 = vmul.f32 %v3026_v48, %v2979_v14  ;;  %v608_v14 = vadd.f32 %v576_v60, %v474_v52 }
  0xc4   : > { %352 = vperm.xlu2 %2458, %v3073_v24   ;;  %v808_v18 = vpop.permute.xlu2 %807  ;;  %v877_v12 = vadd.f32 %v845_v50, %v743_v17  ;;  %v478_v39 = vadd.f32 %v3008_v34, %v441_v27  ;;  %v715_v50 = vmul.f32 %v3028_v49, %v3070_v37 }
  0xc5   : > { %v3095_v62 = vpack.c.bf16 %v906_v46, %v904_v35  ;;  %v3097_v63 = vpack.c.bf16 %v907_v51, %v905_v43  ;;  %v744_v15 = vadd.f32 %v712_v31, %v610_v4  ;;  %v742_v16 = vadd.f32 %v710_v5, %v608_v14  ;;  %2474 = vset.pattern.permute.xlu0 %v2679_v7 }
  0xc6   : > { %v3107_v6 = vpop.permute.xlu0 %815  ;;  %v909_v38 = vmax.f32 %v877_v12, 0.0  ;;  %v911_v43 = vmax.f32 %v879_v29, 0.0  ;;  %v612_v59 = vadd.f32 %v580_v11, %v478_v39  ;;  %v851_v58 = vmul.f32 %v3038_v55, %v808_v18  ;;  %v2147_v39 = vld [vmem:[%s3664_s3 + $0x78] sm:$0xf0]  ;;  %v2139_v11 = vld [vmem:[%s3664_s3 + $0x68] sm:$0xf0] }
  0xc7   : > { %1162 = vmatmul.bf16.vlgmr.msra.gmra.mxu2 %v3095_v62  ;;  %1211 = vmatmul.bf16.vlgmr.msra.gmra.mxu3 %v3097_v63  ;;  %v876_v25 = vadd.f32 %v844_v8, %v742_v16  ;;  %v878_v28 = vadd.f32 %v846_v9, %v744_v15  ;;  %v714_v8 = vmul.f32 %v3026_v48, %v3070_v37 }
  0xc8   : > { %v3144_v4 = vpack.c.bf16 %v911_v43, %v909_v38  ;;  %v850_v9 = vmul.f32 %v3036_v54, %v808_v18  ;;  %v747_v17 = vadd.f32 %v715_v50, %v613_v42  ;;  %v2298_v38 = vld [vmem:[%s3664_s3 + $0x74] sm:$0xf]  ;;  %v2312_v43 = vld [vmem:[%s3664_s3 + $0xe4] sm:$0xf]  ;;  %v584_v42 = vmul.f32 %v3017_v41, %v3024_v47  ;;  %v2195_v50 = vld [vmem:[%s3664_s3 + $0xd8] sm:$0xf0] }
  0xc9   : > { %v398_v10 = vpop.permute.xlu1 %397  ;;  %v908_v33 = vmax.f32 %v876_v25, 0.0  ;;  %v910_v46 = vmax.f32 %v878_v28, 0.0  ;;  %v746_v16 = vadd.f32 %v714_v8, %v612_v59  ;;  %v2310_v59 = vld [vmem:[%s3664_s3 + $0xd4] sm:$0xf]  ;;  %v585_v8 = vmul.f32 %v3019_v44, %v3024_v47  ;;  %v2123_v47 = vld [vmem:[%s3664_s3 + $0x48] sm:$0xf0] }
  0xca   : > { %v443_v30 = vmul.f32 %v2994_v22, %v398_v10  ;;  %v444_v32 = vmul.f32 %v2996_v23, %v398_v10 }
  0xcb   : > { %2459 = vset.pattern.permute.xlu1 %v2677_v1  ;;  %v3142_v61 = vpack.c.bf16 %v910_v46, %v908_v33 }
  0xcc   : > { %357 = vperm.xlu1 %2459, %v2989_v20   ;;  %2460 = vset.pattern.permute.xlu2 %v2676_v0  ;;  %v480_v51 = vadd.f32 %v3008_v34, %v443_v30  ;;  %v481_v52 = vadd.f32 %v3010_v36, %v444_v32 }
  0xcd   : > { %503 = vperm.xlu2 %2460, %v3073_v24   ;;  %v3148_v14 = vpop.permute.xlu2 %407 }
  0xcf   : > { %v674_v40 = vpop.permute.xlu0 %673 }
  0xd0   : > { %v716_v31 = vmul.f32 %v3026_v48, %v674_v40  ;;  %v717_v56 = vmul.f32 %v3028_v49, %v674_v40  ;;  %v2150_v40 = vor.u32 %v2298_v38, %v2147_v39 }
  0xd2   : > { %v540_v35 = vpop.permute.xlu1 %539  ;;  %1232 = vmatpush.bf16.msrb.mxu2 %v2150_v40  ;;  %v2179_v40 = vld [vmem:[%s3664_s3 + $0xb8] sm:$0xf0] }
  0xd3   : > { %v582_v53 = vmul.f32 %v3017_v41, %v540_v35  ;;  %v583_v60 = vmul.f32 %v3019_v44, %v540_v35 }
  0xd4   : > { %2462 = vset.pattern.permute.xlu1 %v2678_v2 }
  0xd5   : > { %v614_v57 = vadd.f32 %v582_v53, %v480_v51  ;;  %v615_v5 = vadd.f32 %v583_v60, %v481_v52  ;;  %637 = vperm.xlu1 %2462, %v3073_v24   ;;  %2463 = vset.pattern.permute.xlu2 %v2678_v2  ;;  %v2203_v51 = vld [vmem:[%s3664_s3 + $0xe8] sm:$0xf0]  ;;  %v2142_v60 = vor.u32 %v2296_v45, %v2139_v11 }
  0xd6   : > { %641 = vperm.xlu2 %2463, %v2989_v20   ;;  %v678_v18 = vpop.permute.xlu2 %677  ;;  %v2206_v21 = vor.u32 %v2312_v43, %v2203_v51 }
  0xd7   : > { %1167 = vmatmul.bf16.gmra.mxu2 %v3142_v61  ;;  %1216 = vmatmul.bf16.gmra.mxu3 %v3144_v4  ;;  %v748_v10 = vadd.f32 %v716_v31, %v614_v57  ;;  %v749_v15 = vadd.f32 %v717_v56, %v615_v5  ;;  %v2131_v56 = vld [vmem:[%s3664_s3 + $0x58] sm:$0xf0] }
  0xd8   : > { %1233 = vmatpush.bf16.msrb.mxu2 %v2142_v60  ;;  %v2107_v60 = vld [vmem:[%s3664_s3 + $0x28] sm:$0xf0] }
  0xd9   : > { %v882_v27 = vadd.f32 %v850_v9, %v748_v10  ;;  %v883_v26 = vadd.f32 %v851_v58, %v749_v15  ;;  %v2198_v15 = vor.u32 %v2310_v59, %v2195_v50 }
  0xdb   : > { %v804_v19 = vpop.permute.xlu1 %803  ;;  %v914_v30 = vmax.f32 %v882_v27, 0.0  ;;  %v915_v33 = vmax.f32 %v883_v26, 0.0  ;;  %v2187_v27 = vld [vmem:[%s3664_s3 + $0xc8] sm:$0xf0]  ;;  %v719_v26 = vmul.f32 %v3028_v49, %v678_v18 }
  0xdc   : > { %v848_v25 = vmul.f32 %v3036_v54, %v804_v19  ;;  %v849_v12 = vmul.f32 %v3038_v55, %v804_v19 }
  0xdd   : > { %2464 = vset.pattern.permute.xlu1 %v2679_v7 }
  0xde   : > { %v880_v37 = vadd.f32 %v848_v25, %v746_v16  ;;  %v881_v28 = vadd.f32 %v849_v12, %v747_v17  ;;  %771 = vperm.xlu1 %2464, %v3073_v24   ;;  %2465 = vset.pattern.permute.xlu2 %v2679_v7  ;;  %v2314_v24 = vld [vmem:[%s3664_s3 + $0xf4] sm:$0xf]  ;;  %v2292_v16 = vld [vmem:[%s3664_s3 + $0x44] sm:$0xf]  ;;  %v718_v25 = vmul.f32 %v3026_v48, %v678_v18  ;;  %v2115_v18 = vld [vmem:[%s3664_s3 + $0x38] sm:$0xf0] }
  0xdf   : > { %775 = vperm.xlu2 %2465, %v2989_v20   ;;  %v2211_v20 = vld [vmem:[%s3664_s3 + $0xf8] sm:$0xf0]  ;;  %v812_v5 = vpop.permute.xlu2 %811  ;;  %v2308_v17 = vld [vmem:[%s3664_s3 + $0xc4] sm:$0xf]  ;;  %v2126_v12 = vor.u32 %v2292_v16, %v2123_v47  ;;  %v2302_v47 = vld [vmem:[%s3664_s3 + $0x94] sm:$0xf] }
  0xe0   : > { %v912_v29 = vmax.f32 %v880_v37, 0.0  ;;  %v913_v32 = vmax.f32 %v881_v28, 0.0  ;;  %v2214_v46 = vor.u32 %v2314_v24, %v2211_v20  ;;  %v852_v38 = vmul.f32 %v3036_v54, %v812_v5  ;;  %v2099_v16 = vld [vmem:[%s3664_s3 + $0x18] sm:$0xf0] }
  0xe1   : > { %v853_v11 = vmul.f32 %v3038_v55, %v812_v5  ;;  %v855_v5 = vmul.f32 %v3038_v55, %v3107_v6 }
  0xe2   : > { %v3191_v52 = vpack.c.bf16 %v914_v30, %v912_v29  ;;  %v3193_v53 = vpack.c.bf16 %v915_v33, %v913_v32  ;;  %1281 = vmatpush.bf16.msrb.mxu3 %v2214_v46  ;;  %v2190_v29 = vor.u32 %v2308_v17, %v2187_v27  ;;  %v447_v30 = vmul.f32 %v2994_v22, %v3148_v14  ;;  %v2288_v46 = vld [vmem:[%s3664_s3 + $0x24] sm:$0xf] }
  0xe3   : > { %v448_v32 = vmul.f32 %v2996_v23, %v3148_v14  ;;  %v2306_v14 = vld [vmem:[%s3664_s3 + $0xb4] sm:$0xf] }
  0xe4   : > { %v403_v35 = vpop.permute.xlu1 %402  ;;  %v484_v43 = vadd.f32 %v3008_v34, %v447_v30  ;;  %v2284_v30 = vld [vmem:[%s3664_s3 + $0x4] sm:$0xf] }
  0xe5   : > { %v445_v31 = vmul.f32 %v2994_v22, %v403_v35  ;;  %v446_v57 = vmul.f32 %v2996_v23, %v403_v35  ;;  %v2182_v35 = vor.u32 %v2306_v14, %v2179_v40  ;;  %v485_v51 = vadd.f32 %v3010_v36, %v448_v32  ;;  %v2300_v32 = vld [vmem:[%s3664_s3 + $0x84] sm:$0xf] }
  0xe6   : > { %2467 = vset.pattern.permute.xlu1 %v2677_v1  ;;  %1282 = vmatpush.bf16.msrb.mxu3 %v2206_v21  ;;  %v2294_v1 = vld [vmem:[%s3664_s3 + $0x54] sm:$0xf]  ;;  %v2304_v21 = vld [vmem:[%s3664_s3 + $0xa4] sm:$0xf] }
  0xe7   : > { %1172 = vmatmul.bf16.gmra.mxu2 %v3191_v52  ;;  %1221 = vmatmul.bf16.gmra.mxu3 %v3193_v53  ;;  %v482_v9 = vadd.f32 %v3008_v34, %v445_v31  ;;  %v483_v58 = vadd.f32 %v3010_v36, %v446_v57  ;;  %v2134_v10 = vor.u32 %v2294_v1, %v2131_v56  ;;  %v2171_v31 = vld [vmem:[%s3664_s3 + $0xa8] sm:$0xf0] }
  0xe8   : > { %367 = vperm.xlu1 %2467, %v3124_v13   ;;  %2468 = vset.pattern.permute.xlu2 %v2676_v0  ;;  %v3241_v33 = vpop.permute.xlu2 %337  ;;  %v854_v57 = vmul.f32 %v3036_v54, %v3107_v6  ;;  %v2286_v6 = vld [vmem:[%s3664_s3 + $0x14] sm:$0xf] }
  0xe9   : > { %511 = vperm.xlu2 %2468, %v3100_v3   ;;  %1234 = vmatpush.bf16.msrb.mxu2 %v2134_v10  ;;  %v616_v37 = vadd.f32 %v584_v42, %v482_v9  ;;  %v617_v28 = vadd.f32 %v585_v8, %v483_v58  ;;  %v2110_v58 = vor.u32 %v2288_v46, %v2107_v60 }
  0xea   : > { %1283 = vmatpush.bf16.msrb.mxu3 %v2198_v15  ;;  %v2174_v10 = vor.u32 %v2304_v21, %v2171_v31  ;;  %v419_v21 = vmul.f32 %v2994_v22, %v3241_v33  ;;  %v420_v31 = vmul.f32 %v2996_v23, %v3241_v33 }
  0xeb   : > { %v750_v20 = vadd.f32 %v718_v25, %v616_v37  ;;  %v751_v45 = vadd.f32 %v719_v26, %v617_v28  ;;  %v2102_v26 = vor.u32 %v2286_v6, %v2099_v16 }
  0xed   : > { %v548_v19 = vpop.permute.xlu1 %547  ;;  %1235 = vmatpush.bf16.msrb.mxu2 %v2126_v12  ;;  %v884_v50 = vadd.f32 %v852_v38, %v750_v20  ;;  %v885_v9 = vadd.f32 %v853_v11, %v751_v45 }
  0xee   : > { %v586_v39 = vmul.f32 %v3017_v41, %v548_v19  ;;  %1284 = vmatpush.bf16.msrb.mxu3 %v2190_v29 }
  0xef   : > { %v917_v27 = vmax.f32 %v885_v9, 0.0 }
  0xf0   : > { %2469 = vset.pattern.permute.xlu1 %v2676_v0  ;;  %v2290_v0 = vld [vmem:[%s3664_s3 + $0x34] sm:$0xf]  ;;  %v618_v56 = vadd.f32 %v586_v39, %v484_v43  ;;  %v622_v43 = vpop.permute.xlu0 %621 }
  0xf1   : > { %515 = vperm.xlu1 %2469, %v3124_v13   ;;  %2470 = vset.pattern.permute.xlu2 %v2678_v2  ;;  %v587_v2 = vmul.f32 %v3019_v44, %v548_v19  ;;  %v2118_v24 = vor.u32 %v2290_v0, %v2115_v18  ;;  %v492_v12 = vpop.permute.xlu2 %491  ;;  %v2155_v0 = vld [vmem:[%s3664_s3 + $0x88] sm:$0xf0] }
  0xf2   : > { %645 = vperm.xlu2 %2470, %v3100_v3   ;;  %1285 = vmatpush.bf16.msrb.mxu3 %v2182_v35  ;;  %v559_v9 = vmul.f32 %v3019_v44, %v492_v12 }
  0xf3   : > { %1236 = vmatpush.bf16.msrb.mxu2 %v2118_v24  ;;  %v619_v59 = vadd.f32 %v587_v2, %v485_v51  ;;  %v2158_v2 = vor.u32 %v2300_v32, %v2155_v0 }
  0xf6   : > { %v682_v1 = vpop.permute.xlu1 %681  ;;  %1286 = vmatpush.bf16.msrb.mxu3 %v2174_v10 }
  0xf7   : > { %v720_v42 = vmul.f32 %v3026_v48, %v682_v1  ;;  %v721_v8 = vmul.f32 %v3028_v49, %v682_v1  ;;  %1237 = vmatpush.bf16.msrb.mxu2 %v2110_v58 }
  0xf9   : > { %v752_v15 = vadd.f32 %v720_v42, %v618_v56  ;;  %v753_v19 = vadd.f32 %v721_v8, %v619_v59  ;;  %2472 = vset.pattern.permute.xlu1 %v2679_v7  ;;  %v690_v56 = vmul.f32 %v3026_v48, %v622_v43  ;;  %v691_v59 = vmul.f32 %v3028_v49, %v622_v43 }
  0xfa   : > { %779 = vperm.xlu1 %2472, %v3100_v3   ;;  %2473 = vset.pattern.permute.xlu2 %v2679_v7  ;;  %v2163_v7 = vld [vmem:[%s3664_s3 + $0x98] sm:$0xf0]  ;;  %v916_v3 = vmax.f32 %v884_v50, 0.0  ;;  %v756_v24 = vpop.permute.xlu2 %755  ;;  %v456_v42 = vadd.f32 %v3008_v34, %v419_v21  ;;  %v457_v8 = vadd.f32 %v3010_v36, %v420_v31  ;;  %v558_v50 = vmul.f32 %v3017_v41, %v492_v12 }
  0xfb   : > { %v886_v17 = vadd.f32 %v854_v57, %v752_v15  ;;  %v887_v25 = vadd.f32 %v855_v5, %v753_v19  ;;  %783 = vperm.xlu2 %2473, %v3124_v13   ;;  %v2166_v37 = vor.u32 %v2302_v47, %v2163_v7  ;;  %v2091_v13 = vld [vmem:[%s3664_s3 + $0x8] sm:$0xf0]  ;;  %1238 = vmatpush.bf16.msrb.mxu2 %v2102_v26 }
  0xfc   : > { %v2094_v39 = vor.u32 %v2284_v30, %v2091_v13  ;;  %v824_v15 = vmul.f32 %v3036_v54, %v756_v24  ;;  %v825_v33 = vmul.f32 %v3038_v55, %v756_v24  ;;  %v590_v47 = vadd.f32 %v558_v50, %v456_v42 }
  0xfd   : > { %v918_v28 = vmax.f32 %v886_v17, 0.0  ;;  %v919_v29 = vmax.f32 %v887_v25, 0.0  ;;  %1287 = vmatpush.bf16.msrb.mxu3 %v2166_v37  ;;  %v591_v17 = vadd.f32 %v559_v9, %v457_v8 }
  0xff   : > { %v333_v18 = vpop.permute.xlu1 %332  ;;  %v3309_v14 = vpack.c.bf16 %v918_v28, %v916_v3  ;;  %v3311_v38 = vpack.c.bf16 %v919_v29, %v917_v27  ;;  %1239 = vmatpush.bf16.msrb.mxu2 %v2094_v39 }
 0x100   : > { %v417_v20 = vmul.f32 %v2994_v22, %v333_v18  ;;  %v418_v45 = vmul.f32 %v2996_v23, %v333_v18 }
 0x101   : > { %1177 = vmatmul.bf16.gmra.mxu2 %v3309_v14  ;;  %1226 = vmatmul.bf16.gmra.mxu3 %v3311_v38 }
 0x102   : > { %1288 = vmatpush.bf16.msrb.mxu3 %v2158_v2  ;;  %v454_v51 = vadd.f32 %v3008_v34, %v417_v20  ;;  %v455_v60 = vadd.f32 %v3010_v36, %v418_v45 }
 0x103   : > { %v343_v11 = vpop.permute.xlu2 %342 }
 0x108   : > { %v488_v40 = vpop.permute.xlu1 %487 }
 0x109   : > { %v556_v35 = vmul.f32 %v3017_v41, %v488_v40  ;;  %v557_v46 = vmul.f32 %v3019_v44, %v488_v40  ;;  %v348_v40 = vpop.permute.xlu0 %347 }
 0x10a   : > { %v423_v20 = vmul.f32 %v2994_v22, %v348_v40  ;;  %v424_v45 = vmul.f32 %v2996_v23, %v348_v40 }
 0x10b   : > { %v588_v5 = vadd.f32 %v556_v35, %v454_v51  ;;  %v589_v1 = vadd.f32 %v557_v46, %v455_v60  ;;  %v421_v35 = vmul.f32 %v2994_v22, %v343_v11  ;;  %v422_v46 = vmul.f32 %v2996_v23, %v343_v11 }
 0x10c   : > { %v500_v16 = vpop.permute.xlu2 %499 }
 0x10d   : > { %v722_v58 = vadd.f32 %v690_v56, %v588_v5  ;;  %v723_v10 = vadd.f32 %v691_v59, %v589_v1  ;;  %v562_v31 = vmul.f32 %v3017_v41, %v500_v16  ;;  %v460_v5 = vadd.f32 %v3008_v34, %v423_v20 }
 0x10e   : > { %v461_v1 = vadd.f32 %v3010_v36, %v424_v45  ;;  %v458_v56 = vadd.f32 %v3008_v34, %v421_v35  ;;  %v459_v59 = vadd.f32 %v3010_v36, %v422_v46 }
 0x10f   : > { %v856_v25 = vadd.f32 %v824_v15, %v722_v58  ;;  %v857_v7 = vadd.f32 %v825_v33, %v723_v10  ;;  %v594_v58 = vadd.f32 %v562_v31, %v460_v5 }
 0x111   : > { %v626_v57 = vpop.permute.xlu1 %625  ;;  %v888_v30 = vmax.f32 %v856_v25, 0.0  ;;  %v889_v32 = vmax.f32 %v857_v7, 0.0  ;;  %v764_v8 = vpop.permute.xlu0 %763 }
 0x112   : > { %v692_v19 = vmul.f32 %v3026_v48, %v626_v57  ;;  %v693_v6 = vmul.f32 %v3028_v49, %v626_v57  ;;  %v563_v57 = vmul.f32 %v3019_v44, %v500_v16  ;;  %v828_v16 = vmul.f32 %v3036_v54, %v764_v8 }
 0x114   : > { %v724_v27 = vadd.f32 %v692_v19, %v590_v47  ;;  %v725_v26 = vadd.f32 %v693_v6, %v591_v17  ;;  %v595_v10 = vadd.f32 %v563_v57, %v461_v1  ;;  %v829_v47 = vmul.f32 %v3038_v55, %v764_v8 }
 0x115   : > { %v634_v2 = vpop.permute.xlu2 %633 }
 0x116   : > { %v696_v15 = vmul.f32 %v3026_v48, %v634_v2  ;;  %v697_v33 = vmul.f32 %v3028_v49, %v634_v2 }
 0x118   : > { %v728_v17 = vadd.f32 %v696_v15, %v594_v58  ;;  %v729_v25 = vadd.f32 %v697_v33, %v595_v10 }
 0x119   : > { %v508_v45 = vpop.permute.xlu0 %507 }
 0x11a   : > { %v760_v3 = vpop.permute.xlu1 %759 }
 0x11b   : > { %v826_v12 = vmul.f32 %v3036_v54, %v760_v3  ;;  %v827_v37 = vmul.f32 %v3038_v55, %v760_v3 }
 0x11d   : > { %v858_v28 = vadd.f32 %v826_v12, %v724_v27  ;;  %v859_v29 = vadd.f32 %v827_v37, %v725_v26 }
 0x11e   : > { %v353_v43 = vpop.permute.xlu2 %352 }
 0x11f   : > { %v890_v13 = vmax.f32 %v858_v28, 0.0  ;;  %v891_v0 = vmax.f32 %v859_v29, 0.0  ;;  %v425_v31 = vmul.f32 %v2994_v22, %v353_v43  ;;  %v426_v57 = vmul.f32 %v2996_v23, %v353_v43 }
 0x121   : > { %v920_v18 = vpack.c.bf16 %v890_v13, %v888_v30  ;;  %v921_v39 = vpack.c.bf16 %v891_v0, %v889_v32  ;;  %v463_v10 = vadd.f32 %v3010_v36, %v426_v57 }
 0x123   : > { %1142 = vmatmul.bf16.vlgmr.msra.gmra.mxu0 %v920_v18  ;;  %1191 = vmatmul.bf16.vlgmr.msra.gmra.mxu1 %v921_v39  ;;  %v496_v24 = vpop.permute.xlu1 %495 }
 0x124   : > { %1240 = vmatmul.bf16.vlgmr.msrb.gmra.mxu2 %v920_v18  ;;  %1289 = vmatmul.bf16.vlgmr.msrb.gmra.mxu3 %v921_v39  ;;  %v560_v51 = vmul.f32 %v3017_v41, %v496_v24  ;;  %v561_v60 = vmul.f32 %v3019_v44, %v496_v24 }
 0x126   : > { %v592_v50 = vadd.f32 %v560_v51, %v458_v56  ;;  %v593_v9 = vadd.f32 %v561_v60, %v459_v59  ;;  %v566_v51 = vmul.f32 %v3017_v41, %v508_v45  ;;  %v567_v60 = vmul.f32 %v3019_v44, %v508_v45 }
 0x127   : > { %v504_v7 = vpop.permute.xlu2 %503 }
 0x128   : > { %v564_v15 = vmul.f32 %v3017_v41, %v504_v7  ;;  %v565_v43 = vmul.f32 %v3019_v44, %v504_v7 }
 0x12c   : > { %v630_v21 = vpop.permute.xlu1 %629 }
 0x12d   : > { %v694_v11 = vmul.f32 %v3026_v48, %v630_v21  ;;  %v695_v42 = vmul.f32 %v3028_v49, %v630_v21  ;;  %v3363_v21 = vld [vmem:[#allocation2] sm:$0x3] }
 0x12e   : > { %v3368_v1 = vperm.slane %v3363_v21, 0 }
 0x12f   : > { %v726_v19 = vadd.f32 %v694_v11, %v592_v50  ;;  %v727_v6 = vadd.f32 %v695_v42, %v593_v9  ;;  %v462_v50 = vadd.f32 %v3008_v34, %v425_v31 }
 0x130   : > { %v642_v24 = vpop.permute.xlu2 %641 }
 0x131   : > { %v860_v27 = vadd.f32 %v828_v16, %v726_v19  ;;  %v861_v26 = vadd.f32 %v829_v47, %v727_v6  ;;  %v700_v56 = vmul.f32 %v3026_v48, %v642_v24  ;;  %v701_v59 = vmul.f32 %v3028_v49, %v642_v24 }
 0x133   : > { %v892_v30 = vmax.f32 %v860_v27, 0.0  ;;  %v893_v32 = vmax.f32 %v861_v26, 0.0  ;;  %v596_v27 = vadd.f32 %v564_v15, %v462_v50  ;;  %v597_v26 = vadd.f32 %v565_v43, %v463_v10 }
 0x135   : > { %v768_v3 = vpop.permute.xlu1 %767 }
 0x136   : > { %v830_v12 = vmul.f32 %v3036_v54, %v768_v3  ;;  %v831_v37 = vmul.f32 %v3038_v55, %v768_v3 }
 0x138   : > { %v862_v28 = vadd.f32 %v830_v12, %v728_v17  ;;  %v863_v29 = vadd.f32 %v831_v37, %v729_v25 }
 0x139   : > { %v776_v8 = vpop.permute.xlu2 %775 }
 0x13a   : > { %v894_v13 = vmax.f32 %v862_v28, 0.0  ;;  %v895_v0 = vmax.f32 %v863_v29, 0.0  ;;  %v834_v16 = vmul.f32 %v3036_v54, %v776_v8  ;;  %v835_v47 = vmul.f32 %v3038_v55, %v776_v8 }
 0x13c   : > { %v922_v18 = vpack.c.bf16 %v894_v13, %v892_v30  ;;  %v923_v39 = vpack.c.bf16 %v895_v0, %v893_v32 }
 0x13e   : > { %1147 = vmatmul.bf16.gmra.mxu0 %v922_v18  ;;  %1196 = vmatmul.bf16.gmra.mxu1 %v923_v39  ;;  %v358_v2 = vpop.permute.xlu1 %357 }
 0x13f   : > { %1245 = vmatmul.bf16.gmra.mxu2 %v922_v18  ;;  %1294 = vmatmul.bf16.gmra.mxu3 %v923_v39  ;;  %v427_v40 = vmul.f32 %v2994_v22, %v358_v2  ;;  %v428_v20 = vmul.f32 %v2996_v23, %v358_v2 }
 0x141   : > { %v464_v35 = vadd.f32 %v3008_v34, %v427_v40  ;;  %v465_v46 = vadd.f32 %v3010_v36, %v428_v20 }
 0x143   : > { %v598_v11 = vadd.f32 %v566_v51, %v464_v35  ;;  %v599_v42 = vadd.f32 %v567_v60, %v465_v46  ;;  %v512_v24 = vpop.permute.xlu2 %511 }
 0x145   : > { %v732_v19 = vadd.f32 %v700_v56, %v598_v11  ;;  %v733_v6 = vadd.f32 %v701_v59, %v599_v42 }
 0x147   : > { %v638_v5 = vpop.permute.xlu1 %637  ;;  %v866_v12 = vadd.f32 %v834_v16, %v732_v19  ;;  %v867_v37 = vadd.f32 %v835_v47, %v733_v6  ;;  %v568_v47 = vmul.f32 %v3017_v41, %v512_v24 }
 0x148   : > { %v698_v17 = vmul.f32 %v3026_v48, %v638_v5  ;;  %v699_v25 = vmul.f32 %v3028_v49, %v638_v5  ;;  %v363_v5 = vpop.permute.xlu0 %362 }
 0x149   : > { %v898_v40 = vmax.f32 %v866_v12, 0.0  ;;  %v899_v46 = vmax.f32 %v867_v37, 0.0  ;;  %v430_v10 = vmul.f32 %v2996_v23, %v363_v5 }
 0x14a   : > { %v1163_v9 = vpop.f32.mrf.mxu2  ;;  %v1212_v58 = vpop.f32.mrf.mxu3  ;;  %v730_v29 = vadd.f32 %v698_v17, %v596_v27  ;;  %v731_v7 = vadd.f32 %v699_v25, %v597_v26  ;;  %v569_v17 = vmul.f32 %v3019_v44, %v512_v24 }
 0x14b   : > { %v1164_v33 = vadd.f32 %v1163_v9, %v3368_v1  ;;  %v467_v6 = vadd.f32 %v3010_v36, %v430_v10 }
 0x14c   : > { %v646_v9 = vpop.permute.xlu2 %645 }
 0x14d   : > { %v1213_v3 = vadd.f32 %v1212_v58, %v1164_v33  ;;  %v429_v58 = vmul.f32 %v2994_v22, %v363_v5 }
 0x14f   : > { %v1346_v51 = vmax.f32 %v1213_v3, 0.0  ;;  %v466_v19 = vadd.f32 %v3008_v34, %v429_v58  ;;  %v2323_v58 = vld [vmem:[#allocation5 + $0x38] sm:$0xff] }
 0x150   : > { %v772_v28 = vpop.permute.xlu1 %771  ;;  %v650_v33 = vpop.permute.xlu0 %649  ;;  %1510 = vmatpush.bf16.msrb.mxu0 %v2323_v58 }
 0x151   : > { %v832_v30 = vmul.f32 %v3036_v54, %v772_v28  ;;  %v833_v13 = vmul.f32 %v3038_v55, %v772_v28  ;;  %v704_v26 = vmul.f32 %v3026_v48, %v650_v33 }
 0x152   : > { %v1165_v32 = vpop.f32.mrf.mxu2  ;;  %v1214_v0 = vpop.f32.mrf.mxu3 }
 0x153   : > { %v864_v18 = vadd.f32 %v832_v30, %v730_v29  ;;  %v865_v39 = vadd.f32 %v833_v13, %v731_v7  ;;  %v1166_v2 = vadd.f32 %v1165_v32, %v3368_v1  ;;  %v705_v29 = vmul.f32 %v3028_v49, %v650_v33 }
 0x155   : > { %v1215_v20 = vadd.f32 %v1214_v0, %v1166_v2  ;;  %v896_v45 = vmax.f32 %v864_v18, 0.0  ;;  %v897_v35 = vmax.f32 %v865_v39, 0.0  ;;  %v784_v7 = vpop.permute.xlu2 %783  ;;  %v600_v0 = vadd.f32 %v568_v47, %v466_v19 }
 0x156   : > { %v601_v18 = vadd.f32 %v569_v17, %v467_v6  ;;  %v702_v2 = vmul.f32 %v3026_v48, %v646_v9  ;;  %v2321_v17 = vld [vmem:[#allocation5 + $0x28] sm:$0xff] }
 0x157   : > { %v1348_v60 = vmax.f32 %v1215_v20, 0.0  ;;  %v924_v31 = vpack.c.bf16 %v898_v40, %v896_v45  ;;  %v925_v57 = vpack.c.bf16 %v899_v46, %v897_v35 }
 0x158   : > { %v734_v46 = vadd.f32 %v702_v2, %v600_v0  ;;  %v2326_v0 = vld [vmem:[#allocation5 + $0x50] sm:$0xff]  ;;  %v2316_v2 = vld [vmem:[#allocation5] sm:$0xff] }
 0x159   : > { %1152 = vmatmul.bf16.gmra.mxu0 %v924_v31  ;;  %1201 = vmatmul.bf16.gmra.mxu1 %v925_v57  ;;  %v3384_v56 = vpack.c.bf16 %v1348_v60, %v1346_v51 }
 0x15a   : > { %1250 = vmatmul.bf16.gmra.mxu2 %v924_v31  ;;  %1299 = vmatmul.bf16.gmra.mxu3 %v925_v57  ;;  %v368_v59 = vpop.permute.xlu1 %367  ;;  %v1168_v11 = vpop.f32.mrf.mxu2 }
 0x15b   : > { %v1169_v42 = vadd.f32 %v1168_v11, %v3368_v1  ;;  %v1217_v8 = vpop.f32.mrf.mxu3  ;;  %v431_v15 = vmul.f32 %v2994_v22, %v368_v59  ;;  %v432_v43 = vmul.f32 %v2996_v23, %v368_v59 }
 0x15d   : > { %v1218_v50 = vadd.f32 %v1217_v8, %v1169_v42  ;;  %v468_v22 = vadd.f32 %v3008_v34, %v431_v15  ;;  %v469_v23 = vadd.f32 %v3010_v36, %v432_v43  ;;  %v703_v34 = vmul.f32 %v3028_v49, %v646_v9 }
 0x15e   : > { %v838_v36 = vmul.f32 %v3036_v54, %v784_v7 }
 0x15f   : > { %v1350_v32 = vmax.f32 %v1218_v50, 0.0  ;;  %v735_v51 = vadd.f32 %v703_v34, %v601_v18 }
 0x162   : > { %v1170_v16 = vpop.f32.mrf.mxu2 }
 0x163   : > { %v1171_v25 = vadd.f32 %v1170_v16, %v3368_v1  ;;  %v1219_v3 = vpop.f32.mrf.mxu3  ;;  %v516_v27 = vpop.permute.xlu1 %515 }
 0x164   : > { %v570_v12 = vmul.f32 %v3017_v41, %v516_v27  ;;  %v571_v37 = vmul.f32 %v3019_v44, %v516_v27  ;;  %v839_v44 = vmul.f32 %v3038_v55, %v784_v7  ;;  %v2320_v27 = vld [vmem:[#allocation5 + $0x20] sm:$0xff] }
 0x165   : > { %v1220_v28 = vadd.f32 %v1219_v3, %v1171_v25  ;;  %v2330_v25 = vld [vmem:[#allocation5 + $0x70] sm:$0xff] }
 0x166   : > { %v602_v30 = vadd.f32 %v570_v12, %v468_v22  ;;  %v603_v13 = vadd.f32 %v571_v37, %v469_v23  ;;  %v2319_v22 = vld [vmem:[#allocation5 + $0x18] sm:$0xff]  ;;  %v2328_v37 = vld [vmem:[#allocation5 + $0x60] sm:$0xff] }
 0x167   : > { %v1352_v39 = vmax.f32 %v1220_v28, 0.0 }
 0x168   : > { %v736_v24 = vadd.f32 %v704_v26, %v602_v30  ;;  %v737_v41 = vadd.f32 %v705_v29, %v603_v13  ;;  %v2329_v26 = vld [vmem:[#allocation5 + $0x68] sm:$0xff]  ;;  %v2318_v29 = vld [vmem:[#allocation5 + $0x10] sm:$0xff]  ;;  %v2327_v30 = vld [vmem:[#allocation5 + $0x58] sm:$0xff] }
 0x169   : > { %v3406_v40 = vpack.c.bf16 %v1352_v39, %v1350_v32  ;;  %v2317_v13 = vld [vmem:[#allocation5 + $0x8] sm:$0xff] }
 0x16a   : > { %v1173_v20 = vpop.f32.mrf.mxu2  ;;  %v870_v60 = vadd.f32 %v838_v36, %v736_v24  ;;  %v871_v57 = vadd.f32 %v839_v44, %v737_v41  ;;  %v2324_v41 = vld [vmem:[#allocation5 + $0x40] sm:$0xff] }
 0x16b   : > { %v1174_v45 = vadd.f32 %v1173_v20, %v3368_v1  ;;  %v1222_v35 = vpop.f32.mrf.mxu3 }
 0x16c   : > { %v780_v31 = vpop.permute.xlu1 %779  ;;  %v902_v8 = vmax.f32 %v870_v60, 0.0  ;;  %v903_v9 = vmax.f32 %v871_v57, 0.0 }
 0x16d   : > { %v1223_v48 = vadd.f32 %v1222_v35, %v1174_v45  ;;  %v836_v49 = vmul.f32 %v3036_v54, %v780_v31  ;;  %v837_v5 = vmul.f32 %v3038_v55, %v780_v31  ;;  %v2322_v54 = vld [vmem:[#allocation5 + $0x30] sm:$0xff]  ;;  %v2331_v55 = vld [vmem:[#allocation5 + $0x78] sm:$0xff] }
 0x16e   : > { %1511 = vmatpush.bf16.msrb.mxu0 %v2322_v54  ;;  %1559 = vmatpush.bf16.msrb.mxu1 %v2331_v55 }
 0x16f   : > { %v868_v59 = vadd.f32 %v836_v49, %v734_v46  ;;  %v869_v11 = vadd.f32 %v837_v5, %v735_v51  ;;  %v1354_v16 = vmax.f32 %v1223_v48, 0.0  ;;  %v3426_v51 = vperm.slane %v3363_v21, 1 }
 0x171   : > { %v900_v42 = vmax.f32 %v868_v59, 0.0  ;;  %v901_v50 = vmax.f32 %v869_v11, 0.0 }
 0x172   : > { %v1175_v10 = vpop.f32.mrf.mxu2  ;;  %1512 = vmatpush.bf16.msrb.mxu0 %v2321_v17  ;;  %1560 = vmatpush.bf16.msrb.mxu1 %v2330_v25 }
 0x173   : > { %v1176_v15 = vadd.f32 %v1175_v10, %v3368_v1  ;;  %v926_v43 = vpack.c.bf16 %v902_v8, %v900_v42  ;;  %v927_v33 = vpack.c.bf16 %v903_v9, %v901_v50  ;;  %v1224_v19 = vpop.f32.mrf.mxu3 }
 0x175   : > { %v1225_v6 = vadd.f32 %v1224_v19, %v1176_v15  ;;  %1157 = vmatmul.bf16.gmra.mxu0 %v926_v43  ;;  %1206 = vmatmul.bf16.gmra.mxu1 %v927_v33 }
 0x176   : > { %1255 = vmatmul.bf16.gmra.mxu2 %v926_v43  ;;  %1304 = vmatmul.bf16.gmra.mxu3 %v927_v33 }
 0x177   : > { %v1356_v47 = vmax.f32 %v1225_v6, 0.0  ;;  %1513 = vmatpush.bf16.msrb.mxu0 %v2320_v27  ;;  %1561 = vmatpush.bf16.msrb.mxu1 %v2329_v26 }
 0x179   : > { %v3412_v3 = vpack.c.bf16 %v1356_v47, %v1354_v16 }
 0x17b   : > { %1514 = vmatpush.bf16.msrb.mxu0 %v2319_v22  ;;  %1562 = vmatpush.bf16.msrb.mxu1 %v2328_v37 }
 0x17f   : > { %1515 = vmatpush.bf16.msrb.mxu0 %v2318_v29  ;;  %1563 = vmatpush.bf16.msrb.mxu1 %v2327_v30 }
 0x183   : > { %1516 = vmatpush.bf16.msrb.mxu0 %v2317_v13  ;;  %1564 = vmatpush.bf16.msrb.mxu1 %v2326_v0 }
 0x184   : > { %v1178_v23 = vpop.f32.mrf.mxu2  ;;  %v1227_v12 = vpop.f32.mrf.mxu3 }
 0x185   : > { %v1179_v28 = vadd.f32 %v1178_v23, %v3368_v1 }
 0x186   : > { %1260 = vmatmul.bf16.gmra.mxu2 %v3095_v62  ;;  %1309 = vmatmul.bf16.gmra.mxu3 %v3097_v63  ;;  %v2325_v62 = vld [vmem:[#allocation5 + $0x48] sm:$0xff] }
 0x187   : > { %v1228_v7 = vadd.f32 %v1227_v12, %v1179_v28  ;;  %1517 = vmatpush.bf16.msrb.mxu0 %v2316_v2  ;;  %1565 = vmatpush.bf16.msrb.mxu1 %v2325_v62 }
 0x189   : > { %v1358_v24 = vmax.f32 %v1228_v7, 0.0 }
 0x18b   : > { %1566 = vmatpush.bf16.msrb.mxu1 %v2324_v41 }
 0x18c   : > { %v1180_v32 = vpop.f32.mrf.mxu2  ;;  %v1229_v39 = vpop.f32.mrf.mxu3 }
 0x18d   : > { %v1181_v18 = vadd.f32 %v1180_v32, %v3368_v1 }
 0x18f   : > { %v1230_v34 = vadd.f32 %v1229_v39, %v1181_v18 }
 0x191   : > { %v1360_v63 = vmax.f32 %v1230_v34, 0.0 }
 0x193   : > { %v3418_v36 = vpack.c.bf16 %v1360_v63, %v1358_v24 }
 0x196   : > { %1265 = vmatmul.bf16.gmra.mxu2 %v3142_v61  ;;  %1314 = vmatmul.bf16.gmra.mxu3 %v3144_v4 }
 0x1a0   : > { %v1143_v44 = vpop.f32.mrf.mxu0  ;;  %v1192_v20 = vpop.f32.mrf.mxu1 }
 0x1a1   : > { %v1144_v45 = vadd.f32 %v1143_v44, %v3368_v1 }
 0x1a3   : > { %v1193_v31 = vadd.f32 %v1192_v20, %v1144_v45 }
 0x1a5   : > { %v1330_v49 = vmax.f32 %v1193_v31, 0.0 }
 0x1a6   : > { %1270 = vmatmul.bf16.gmra.mxu2 %v3191_v52  ;;  %1319 = vmatmul.bf16.gmra.mxu3 %v3193_v53 }
 0x1a7   : > { %v1241_v35 = vpop.f32.mrf.mxu2  ;;  %v1290_v46 = vpop.f32.mrf.mxu3 }
 0x1a8   : > { %v1145_v60 = vpop.f32.mrf.mxu0  ;;  %v1194_v57 = vpop.f32.mrf.mxu1  ;;  %v1242_v48 = vadd.f32 %v1241_v35, %v3426_v51 }
 0x1a9   : > { %v1146_v61 = vadd.f32 %v1145_v60, %v3368_v1 }
 0x1aa   : > { %v1291_v52 = vadd.f32 %v1290_v46, %v1242_v48 }
 0x1ab   : > { %v1195_v4 = vadd.f32 %v1194_v57, %v1146_v61 }
 0x1ac   : > { %v1331_v21 = vmax.f32 %v1291_v52, 0.0 }
 0x1ad   : > { %v1332_v5 = vmax.f32 %v1195_v4, 0.0 }
 0x1af   : > { %v1362_v59 = vpack.c.bf16 %v1332_v5, %v1330_v49  ;;  %v1243_v11 = vpop.f32.mrf.mxu2  ;;  %v1292_v42 = vpop.f32.mrf.mxu3 }
 0x1b0   : > { %v1244_v53 = vadd.f32 %v1243_v11, %v3426_v51 }
 0x1b1   : > { %1518 = vmatmul.bf16.vlgmr.msrb.gmra.mxu0 %v1362_v59 }
 0x1b2   : > { %v1293_v8 = vadd.f32 %v1292_v42, %v1244_v53 }
 0x1b4   : > { %v1333_v50 = vmax.f32 %v1293_v8, 0.0 }
 0x1b6   : > { %v1363_v9 = vpack.c.bf16 %v1333_v50, %v1331_v21  ;;  %1275 = vmatmul.bf16.gmra.mxu2 %v3309_v14  ;;  %1324 = vmatmul.bf16.gmra.mxu3 %v3311_v38 }
 0x1b8   : > { %1567 = vmatmul.bf16.vlgmr.msrb.gmra.mxu1 %v1363_v9 }
 0x1bb   : > { %v1148_v58 = vpop.f32.mrf.mxu0  ;;  %v1197_v10 = vpop.f32.mrf.mxu1 }
 0x1bc   : > { %v1149_v15 = vadd.f32 %v1148_v58, %v3368_v1 }
 0x1be   : > { %v1198_v6 = vadd.f32 %v1197_v10, %v1149_v15 }
 0x1c0   : > { %v1334_v17 = vmax.f32 %v1198_v6, 0.0 }
 0x1c2   : > { %v1246_v43 = vpop.f32.mrf.mxu2  ;;  %v1295_v33 = vpop.f32.mrf.mxu3 }
 0x1c3   : > { %v1150_v19 = vpop.f32.mrf.mxu0  ;;  %v1199_v55 = vpop.f32.mrf.mxu1  ;;  %v1247_v47 = vadd.f32 %v1246_v43, %v3426_v51 }
 0x1c4   : > { %v1151_v54 = vadd.f32 %v1150_v19, %v3368_v1 }
 0x1c5   : > { %v1296_v38 = vadd.f32 %v1295_v33, %v1247_v47 }
 0x1c6   : > { %v1200_v16 = vadd.f32 %v1199_v55, %v1151_v54 }
 0x1c7   : > { %v1335_v12 = vmax.f32 %v1296_v38, 0.0 }
 0x1c8   : > { %v1336_v25 = vmax.f32 %v1200_v16, 0.0 }
 0x1ca   : > { %v1248_v14 = vpop.f32.mrf.mxu2  ;;  %v1364_v27 = vpack.c.bf16 %v1336_v25, %v1334_v17  ;;  %v1297_v22 = vpop.f32.mrf.mxu3 }
 0x1cb   : > { %v1249_v26 = vadd.f32 %v1248_v14, %v3426_v51 }
 0x1cc   : > { %1523 = vmatmul.bf16.gmra.mxu0 %v1364_v27 }
 0x1cd   : > { %v1298_v23 = vadd.f32 %v1297_v22, %v1249_v26 }
 0x1cf   : > { %v1337_v37 = vmax.f32 %v1298_v23, 0.0 }
 0x1d1   : > { %v1365_v28 = vpack.c.bf16 %v1337_v37, %v1335_v12 }
 0x1d3   : > { %1572 = vmatmul.bf16.gmra.mxu1 %v1365_v28 }
 0x1d6   : > { %v1153_v29 = vpop.f32.mrf.mxu0  ;;  %v1202_v7 = vpop.f32.mrf.mxu1 }
 0x1d7   : > { %v1154_v30 = vadd.f32 %v1153_v29, %v3368_v1 }
 0x1d9   : > { %v1203_v18 = vadd.f32 %v1202_v7, %v1154_v30 }
 0x1db   : > { %v1338_v24 = vmax.f32 %v1203_v18, 0.0 }
 0x1dd   : > { %v1251_v13 = vpop.f32.mrf.mxu2  ;;  %v1300_v32 = vpop.f32.mrf.mxu3 }
 0x1de   : > { %v1155_v0 = vpop.f32.mrf.mxu0  ;;  %v1204_v2 = vpop.f32.mrf.mxu1  ;;  %v1252_v62 = vadd.f32 %v1251_v13, %v3426_v51 }
 0x1df   : > { %v1156_v39 = vadd.f32 %v1155_v0, %v3368_v1 }
 0x1e0   : > { %v1301_v20 = vadd.f32 %v1300_v32, %v1252_v62  ;;  %v3455_v62 = vld [vmem:[%s3667_s6] ss:$0 sm:$0xff] }
 0x1e1   : > { %v1205_v34 = vadd.f32 %v1204_v2, %v1156_v39 }
 0x1e2   : > { %v1339_v60 = vmax.f32 %v1301_v20, 0.0 }
 0x1e3   : > { %v1340_v63 = vmax.f32 %v1205_v34, 0.0 }
 0x1e5   : > { %v1253_v41 = vpop.f32.mrf.mxu2  ;;  %v1366_v44 = vpack.c.bf16 %v1340_v63, %v1338_v24  ;;  %v1302_v35 = vpop.f32.mrf.mxu3 }
 0x1e6   : > { %v1254_v45 = vadd.f32 %v1253_v41, %v3426_v51 }
 0x1e7   : > { %1528 = vmatmul.bf16.gmra.mxu0 %v1366_v44 }
 0x1e8   : > { %v1303_v46 = vadd.f32 %v1302_v35, %v1254_v45 }
 0x1ea   : > { %v1341_v31 = vmax.f32 %v1303_v46, 0.0 }
 0x1ec   : > { %v1367_v61 = vpack.c.bf16 %v1341_v31, %v1339_v60 }
 0x1ee   : > { %1577 = vmatmul.bf16.gmra.mxu1 %v1367_v61 }
 0x1f2   : > { %v1158_v57 = vpop.f32.mrf.mxu0  ;;  %v1207_v4 = vpop.f32.mrf.mxu1 }
 0x1f3   : > { %v1159_v48 = vadd.f32 %v1158_v57, %v3368_v1 }
 0x1f5   : > { %v1208_v11 = vadd.f32 %v1207_v4, %v1159_v48 }
 0x1f7   : > { %v1342_v21 = vmax.f32 %v1208_v11, 0.0 }
 0x1f9   : > { %v1256_v49 = vpop.f32.mrf.mxu2  ;;  %v1305_v5 = vpop.f32.mrf.mxu3 }
 0x1fa   : > { %v1160_v59 = vpop.f32.mrf.mxu0  ;;  %v1209_v53 = vpop.f32.mrf.mxu1  ;;  %v1257_v8 = vadd.f32 %v1256_v49, %v3426_v51 }
 0x1fb   : > { %v1161_v52 = vadd.f32 %v1160_v59, %v3368_v1 }
 0x1fc   : > { %v1306_v15 = vadd.f32 %v1305_v5, %v1257_v8 }
 0x1fd   : > { %v1210_v42 = vadd.f32 %v1209_v53, %v1161_v52 }
 0x1fe   : > { %v1343_v19 = vmax.f32 %v1306_v15, 0.0 }
 0x1ff   : > { %v1344_v50 = vmax.f32 %v1210_v42, 0.0 }
 0x201   : > { %v1258_v9 = vpop.f32.mrf.mxu2  ;;  %v1307_v58 = vpop.f32.mrf.mxu3  ;;  %v1368_v10 = vpack.c.bf16 %v1344_v50, %v1342_v21 }
 0x202   : > { %v1259_v43 = vadd.f32 %v1258_v9, %v3426_v51 }
 0x203   : > { %1533 = vmatmul.bf16.gmra.mxu0 %v1368_v10 }
 0x204   : > { %v1308_v33 = vadd.f32 %v1307_v58, %v1259_v43 }
 0x206   : > { %v1345_v6 = vmax.f32 %v1308_v33, 0.0 }
 0x208   : > { %v1369_v54 = vpack.c.bf16 %v1345_v6, %v1343_v19 }
 0x209   : > { %v1261_v55 = vpop.f32.mrf.mxu2  ;;  %v1310_v16 = vpop.f32.mrf.mxu3 }
 0x20a   : > { %1582 = vmatmul.bf16.gmra.mxu1 %v1369_v54  ;;  %v1262_v1 = vadd.f32 %v1261_v55, %v3426_v51 }
 0x20c   : > { %v1311_v25 = vadd.f32 %v1310_v16, %v1262_v1 }
 0x20e   : > { %v1347_v38 = vmax.f32 %v1311_v25, 0.0 }
 0x211   : > { %v1263_v47 = vpop.f32.mrf.mxu2  ;;  %v1312_v17 = vpop.f32.mrf.mxu3 }
 0x212   : > { %v1264_v14 = vadd.f32 %v1263_v47, %v3426_v51 }
 0x213   : > { %1538 = vmatmul.bf16.gmra.mxu0 %v3384_v56 }
 0x214   : > { %v1313_v27 = vadd.f32 %v1312_v17, %v1264_v14 }
 0x216   : > { %v1349_v26 = vmax.f32 %v1313_v27, 0.0 }
 0x218   : > { %v1371_v22 = vpack.c.bf16 %v1349_v26, %v1347_v38 }
 0x219   : > { %v1266_v23 = vpop.f32.mrf.mxu2  ;;  %v1315_v12 = vpop.f32.mrf.mxu3 }
 0x21a   : > { %1587 = vmatmul.bf16.gmra.mxu1 %v1371_v22  ;;  %v1267_v37 = vadd.f32 %v1266_v23, %v3426_v51 }
 0x21c   : > { %v1316_v7 = vadd.f32 %v1315_v12, %v1267_v37 }
 0x21e   : > { %v1351_v32 = vmax.f32 %v1316_v7, 0.0 }
 0x221   : > { %v1268_v28 = vpop.f32.mrf.mxu2  ;;  %v1317_v29 = vpop.f32.mrf.mxu3 }
 0x222   : > { %v1269_v30 = vadd.f32 %v1268_v28, %v3426_v51 }
 0x223   : > { %1543 = vmatmul.bf16.gmra.mxu0 %v3406_v40 }
 0x224   : > { %v1318_v13 = vadd.f32 %v1317_v29, %v1269_v30 }
 0x226   : > { %v1353_v0 = vmax.f32 %v1318_v13, 0.0 }
 0x228   : > { %v1373_v56 = vpack.c.bf16 %v1353_v0, %v1351_v32 }
 0x229   : > { %v1271_v18 = vpop.f32.mrf.mxu2  ;;  %v1320_v39 = vpop.f32.mrf.mxu3 }
 0x22a   : > { %1592 = vmatmul.bf16.gmra.mxu1 %v1373_v56  ;;  %v1272_v2 = vadd.f32 %v1271_v18, %v3426_v51 }
 0x22c   : > { %v1321_v41 = vadd.f32 %v1320_v39, %v1272_v2 }
 0x22e   : > { %v1519_v34 = vpop.f32.mrf.mxu0  ;;  %v1355_v35 = vmax.f32 %v1321_v41, 0.0 }
 0x22f   : > { %v1520_v44 = vadd.f32 %v3455_v62, %v1519_v34 }
 0x231   : > { %v1273_v24 = vpop.f32.mrf.mxu2  ;;  %v1322_v63 = vpop.f32.mrf.mxu3 }
 0x232   : > { %v1274_v40 = vadd.f32 %v1273_v24, %v3426_v51 }
 0x233   : > { %1548 = vmatmul.bf16.gmra.mxu0 %v3412_v3 }
 0x234   : > { %v1323_v20 = vadd.f32 %v1322_v63, %v1274_v40 }
 0x235   : > { %v1568_v45 = vpop.f32.mrf.mxu1 }
 0x236   : > { %v1357_v46 = vmax.f32 %v1323_v20, 0.0  ;;  %v3460_v60 = vadd.f32 %v1568_v45, %v1520_v44  ;;  %v1521_v31 = vpop.f32.mrf.mxu0 }
 0x237   : > { %v1522_v48 = vadd.f32 %v3455_v62, %v1521_v31 }
 0x238   : > { %1608 = vmax.xlane.f32.xlu1 %v3460_v60  ;;  %v1375_v61 = vpack.c.bf16 %v1357_v46, %v1355_v35 }
 0x239   : > { %v1276_v57 = vpop.f32.mrf.mxu2  ;;  %v1325_v4 = vpop.f32.mrf.mxu3 }
 0x23a   : > { %1597 = vmatmul.bf16.gmra.mxu1 %v1375_v61  ;;  %v1277_v3 = vadd.f32 %v1276_v57, %v3426_v51 }
 0x23c   : > { %v1326_v11 = vadd.f32 %v1325_v4, %v1277_v3 }
 0x23d   : > { %v1570_v49 = vpop.f32.mrf.mxu1 }
 0x23e   : > { %v3465_v5 = vadd.f32 %v1570_v49, %v1522_v48  ;;  %v1359_v8 = vmax.f32 %v1326_v11, 0.0 }
 0x240   : > { %1610 = vmax.xlane.f32.xlu2 %v3465_v5 }
 0x241   : > { %v1278_v59 = vpop.f32.mrf.mxu2  ;;  %v1327_v53 = vpop.f32.mrf.mxu3 }
 0x242   : > { %v1279_v52 = vadd.f32 %v1278_v59, %v3426_v51 }
 0x243   : > { %1553 = vmatmul.bf16.gmra.mxu0 %v3418_v36 }
 0x244   : > { %v1328_v42 = vadd.f32 %v1327_v53, %v1279_v52 }
 0x246   : > { %v1361_v21 = vmax.f32 %v1328_v42, 0.0 }
 0x248   : > { %v1377_v50 = vpack.c.bf16 %v1361_v21, %v1359_v8 }
 0x249   : > { %v1524_v9 = vpop.f32.mrf.mxu0 }
 0x24a   : > { %1602 = vmatmul.bf16.gmra.mxu1 %v1377_v50  ;;  %v1525_v58 = vadd.f32 %v3455_v62, %v1524_v9 }
 0x250   : > { %v1573_v10 = vpop.f32.mrf.mxu1 }
 0x251   : > { %v3471_v15 = vadd.f32 %v1573_v10, %v1525_v58  ;;  %v1526_v43 = vpop.f32.mrf.mxu0 }
 0x252   : > { %v1527_v33 = vadd.f32 %v3455_v62, %v1526_v43 }
 0x253   : > { %1612 = vmax.xlane.f32.xlu0 %v3471_v15 }
 0x258   : > { %v1575_v51 = vpop.f32.mrf.mxu1 }
 0x259   : > { %v3475_v19 = vadd.f32 %v1575_v51, %v1527_v33 }
 0x25b   : > { %1614 = vmax.xlane.f32.xlu2 %v3475_v19 }
 0x264   : > { %v1529_v36 = vpop.f32.mrf.mxu0 }
 0x265   : > { %v1530_v6 = vadd.f32 %v3455_v62, %v1529_v36 }
 0x26b   : > { %v1578_v54 = vpop.f32.mrf.mxu1 }
 0x26c   : > { %v3479_v55 = vadd.f32 %v1578_v54, %v1530_v6  ;;  %v1531_v16 = vpop.f32.mrf.mxu0 }
 0x26d   : > { %v1532_v1 = vadd.f32 %v3455_v62, %v1531_v16 }
 0x26e   : > { %1616 = vmax.xlane.f32.xlu1 %v3479_v55 }
 0x273   : > { %v1580_v47 = vpop.f32.mrf.mxu1 }
 0x274   : > { %v3483_v17 = vadd.f32 %v1580_v47, %v1532_v1 }
 0x276   : > { %1618 = vmax.xlane.f32.xlu2 %v3483_v17 }
 0x280   : > { %v1534_v25 = vpop.f32.mrf.mxu0 }
 0x281   : > { %v1535_v14 = vadd.f32 %v3455_v62, %v1534_v25 }
 0x287   : > { %v1583_v27 = vpop.f32.mrf.mxu1 }
 0x288   : > { %v3487_v38 = vadd.f32 %v1583_v27, %v1535_v14  ;;  %v1536_v26 = vpop.f32.mrf.mxu0 }
 0x289   : > { %v1537_v22 = vadd.f32 %v3455_v62, %v1536_v26 }
 0x28a   : > { %1620 = vmax.xlane.f32.xlu0 %v3487_v38 }
 0x28f   : > { %v1585_v23 = vpop.f32.mrf.mxu1 }
 0x290   : > { %v3491_v12 = vadd.f32 %v1585_v23, %v1537_v22  ;;  %v1539_v37 = vpop.f32.mrf.mxu0 }
 0x291   : > { %v1540_v28 = vadd.f32 %v3455_v62, %v1539_v37 }
 0x292   : > { %1622 = vmax.xlane.f32.xlu1 %v3491_v12 }
 0x297   : > { %v1588_v29 = vpop.f32.mrf.mxu1 }
 0x298   : > { %v3495_v7 = vadd.f32 %v1588_v29, %v1540_v28  ;;  %v1541_v30 = vpop.f32.mrf.mxu0 }
 0x299   : > { %v1542_v13 = vadd.f32 %v3455_v62, %v1541_v30 }
 0x29a   : > { %1624 = vmax.xlane.f32.xlu2 %v3495_v7 }
 0x29f   : > { %v1590_v32 = vpop.f32.mrf.mxu1 }
 0x2a0   : > { %v3499_v0 = vadd.f32 %v1590_v32, %v1542_v13  ;;  %v1544_v56 = vpop.f32.mrf.mxu0 }
 0x2a1   : > { %v1545_v18 = vadd.f32 %v3455_v62, %v1544_v56 }
 0x2a2   : > { %1626 = vmax.xlane.f32.xlu0 %v3499_v0 }
 0x2a7   : > { %v1593_v39 = vpop.f32.mrf.mxu1 }
 0x2a8   : > { %v3503_v2 = vadd.f32 %v1593_v39, %v1545_v18  ;;  %v1546_v34 = vpop.f32.mrf.mxu0 }
 0x2a9   : > { %v1547_v24 = vadd.f32 %v3455_v62, %v1546_v34 }
 0x2aa   : > { %1628 = vmax.xlane.f32.xlu1 %v3503_v2 }
 0x2ab   : > { %v1609_v45 = vpop.xlane.xlu1 %1608 }
 0x2ac   : > { %v1640_v31 = vsub.f32 %v3460_v60, %v1609_v45 }
 0x2ae   : > { %v1656_v57 = vmul.f32 1.442695, %v1640_v31 }
 0x2af   : > { %v1595_v63 = vpop.f32.mrf.mxu1 }
 0x2b0   : > { %v3507_v41 = vadd.f32 %v1595_v63, %v1547_v24  ;;  %v1549_v40 = vpop.f32.mrf.mxu0  ;;  %2476 = vpow2.f32 %v1656_v57 }
 0x2b1   : > { %v1550_v44 = vadd.f32 %v3455_v62, %v1549_v40 }
 0x2b2   : > { %1630 = vmax.xlane.f32.xlu2 %v3507_v41 }
 0x2b3   : > { %v1611_v48 = vpop.xlane.xlu2 %1610 }
 0x2b4   : > { %v1641_v59 = vsub.f32 %v3465_v5, %v1611_v48 }
 0x2b6   : > { %v1658_v52 = vmul.f32 1.442695, %v1641_v59  ;;  %v3523_v60 = vpop.eup %2476 }
 0x2b7   : > { %v1598_v20 = vpop.f32.mrf.mxu1 }
 0x2b8   : > { %v3511_v35 = vadd.f32 %v1598_v20, %v1550_v44  ;;  %v1551_v46 = vpop.f32.mrf.mxu0  ;;  %2478 = vpow2.f32 %v1658_v52 }
 0x2b9   : > { %v1552_v61 = vadd.f32 %v3455_v62, %v1551_v46 }
 0x2ba   : > { %1632 = vmax.xlane.f32.xlu0 %v3511_v35 }
 0x2be   : > { %v3532_v51 = vpop.eup %2478 }
 0x2bf   : > { %v1600_v4 = vpop.f32.mrf.mxu1 }
 0x2c0   : > { %v3516_v49 = vadd.f32 %v1600_v4, %v1552_v61  ;;  %v1554_v3 = vpop.f32.mrf.mxu0 }
 0x2c1   : > { %v1555_v11 = vadd.f32 %v3455_v62, %v1554_v3 }
 0x2c2   : > { %1634 = vmax.xlane.f32.xlu1 %v3516_v49 }
 0x2c6   : > { %v1613_v42 = vpop.xlane.xlu0 %1612 }
 0x2c7   : > { %v1603_v53 = vpop.f32.mrf.mxu1  ;;  %v1642_v21 = vsub.f32 %v3471_v15, %v1613_v42 }
 0x2c8   : > { %v3521_v8 = vadd.f32 %v1603_v53, %v1555_v11  ;;  %v1556_v50 = vpop.f32.mrf.mxu0 }
 0x2c9   : > { %v1660_v9 = vmul.f32 1.442695, %v1642_v21  ;;  %v1557_v5 = vadd.f32 %v3455_v62, %v1556_v50 }
 0x2ca   : > { %1636 = vmax.xlane.f32.xlu2 %v3521_v8  ;;  %1688 = vadd.xlane.f32.xlu1 %v3523_v60 }
 0x2cb   : > { %2480 = vpow2.f32 %v1660_v9 }
 0x2ce   : > { %v1615_v58 = vpop.xlane.xlu2 %1614 }
 0x2cf   : > { %v1605_v10 = vpop.f32.mrf.mxu1  ;;  %v1643_v43 = vsub.f32 %v3475_v19, %v1615_v58 }
 0x2d0   : > { %v3530_v33 = vadd.f32 %v1605_v10, %v1557_v5 }
 0x2d1   : > { %v1662_v36 = vmul.f32 1.442695, %v1643_v43  ;;  %v3536_v15 = vpop.eup %2480 }
 0x2d2   : > { %1690 = vadd.xlane.f32.xlu2 %v3532_v51  ;;  %1638 = vmax.xlane.f32.xlu0 %v3530_v33 }
 0x2d3   : > { %2482 = vpow2.f32 %v1662_v36 }
 0x2d9   : > { %v3538_v6 = vpop.eup %2482 }
 0x2da   : > { %1692 = vadd.xlane.f32.xlu0 %v3536_v15  ;;  %1694 = vadd.xlane.f32.xlu1 %v3538_v6 }
 0x2e1   : > { %v1617_v62 = vpop.xlane.xlu1 %1616 }
 0x2e2   : > { %v1644_v19 = vsub.f32 %v3479_v55, %v1617_v62 }
 0x2e4   : > { %v1664_v54 = vmul.f32 1.442695, %v1644_v19 }
 0x2e6   : > { %2484 = vpow2.f32 %v1664_v54 }
 0x2e9   : > { %v1619_v16 = vpop.xlane.xlu2 %1618 }
 0x2ea   : > { %v1645_v1 = vsub.f32 %v3483_v17, %v1619_v16 }
 0x2ec   : > { %v3544_v47 = vpop.eup %2484  ;;  %v1666_v25 = vmul.f32 1.442695, %v1645_v1 }
 0x2ed   : > { %1696 = vadd.xlane.f32.xlu2 %v3544_v47 }
 0x2ee   : > { %2486 = vpow2.f32 %v1666_v25 }
 0x2f4   : > { %v3547_v14 = vpop.eup %2486 }
 0x2f5   : > { %1698 = vadd.xlane.f32.xlu0 %v3547_v14 }
 0x2fd   : > { %v1621_v27 = vpop.xlane.xlu0 %1620 }
 0x2fe   : > { %v1646_v26 = vsub.f32 %v3487_v38, %v1621_v27 }
 0x300   : > { %v1668_v22 = vmul.f32 1.442695, %v1646_v26 }
 0x302   : > { %2488 = vpow2.f32 %v1668_v22 }
 0x305   : > { %v1623_v55 = vpop.xlane.xlu1 %1622 }
 0x306   : > { %v1647_v23 = vsub.f32 %v3491_v12, %v1623_v55 }
 0x308   : > { %v3552_v37 = vpop.eup %2488  ;;  %v1670_v17 = vmul.f32 1.442695, %v1647_v23 }
 0x309   : > { %1700 = vadd.xlane.f32.xlu1 %v3552_v37 }
 0x30a   : > { %2490 = vpow2.f32 %v1670_v17 }
 0x30d   : > { %v1625_v28 = vpop.xlane.xlu2 %1624 }
 0x30e   : > { %v1648_v29 = vsub.f32 %v3495_v7, %v1625_v28 }
 0x310   : > { %v3556_v30 = vpop.eup %2490  ;;  %v1672_v13 = vmul.f32 1.442695, %v1648_v29 }
 0x311   : > { %1702 = vadd.xlane.f32.xlu2 %v3556_v30 }
 0x312   : > { %2492 = vpow2.f32 %v1672_v13 }
 0x315   : > { %v1627_v38 = vpop.xlane.xlu0 %1626 }
 0x316   : > { %v1649_v32 = vsub.f32 %v3499_v0, %v1627_v38 }
 0x318   : > { %v3560_v56 = vpop.eup %2492  ;;  %v1674_v12 = vmul.f32 1.442695, %v1649_v32 }
 0x319   : > { %1704 = vadd.xlane.f32.xlu0 %v3560_v56 }
 0x31a   : > { %2494 = vpow2.f32 %v1674_v12 }
 0x31d   : > { %v1629_v18 = vpop.xlane.xlu1 %1628 }
 0x31e   : > { %v1650_v39 = vsub.f32 %v3503_v2, %v1629_v18 }
 0x320   : > { %v3564_v34 = vpop.eup %2494  ;;  %v1676_v7 = vmul.f32 1.442695, %v1650_v39 }
 0x321   : > { %1706 = vadd.xlane.f32.xlu1 %v3564_v34 }
 0x322   : > { %2496 = vpow2.f32 %v1676_v7 }
 0x325   : > { %v1631_v24 = vpop.xlane.xlu2 %1630 }
 0x326   : > { %v1651_v63 = vsub.f32 %v3507_v41, %v1631_v24 }
 0x328   : > { %v3568_v40 = vpop.eup %2496  ;;  %v1678_v0 = vmul.f32 1.442695, %v1651_v63 }
 0x329   : > { %1708 = vadd.xlane.f32.xlu2 %v3568_v40 }
 0x32a   : > { %2498 = vpow2.f32 %v1678_v0 }
 0x32d   : > { %v1633_v44 = vpop.xlane.xlu0 %1632 }
 0x32e   : > { %v1652_v20 = vsub.f32 %v3511_v35, %v1633_v44 }
 0x330   : > { %v3572_v45 = vpop.eup %2498  ;;  %v1680_v2 = vmul.f32 1.442695, %v1652_v20 }
 0x331   : > { %1710 = vadd.xlane.f32.xlu0 %v3572_v45 }
 0x332   : > { %2500 = vpow2.f32 %v1680_v2 }
 0x335   : > { %v1635_v46 = vpop.xlane.xlu1 %1634 }
 0x336   : > { %v1653_v31 = vsub.f32 %v3516_v49, %v1635_v46 }
 0x338   : > { %v3576_v61 = vpop.eup %2500  ;;  %v1682_v41 = vmul.f32 1.442695, %v1653_v31 }
 0x339   : > { %1712 = vadd.xlane.f32.xlu1 %v3576_v61 }
 0x33a   : > { %2502 = vpow2.f32 %v1682_v41 }
 0x33d   : > { %v1637_v57 = vpop.xlane.xlu2 %1636  ;;  %v1689_v4 = vpop.xlane.xlu1 %1688 }
 0x33e   : > { %v1654_v35 = vsub.f32 %v3521_v8, %v1637_v57  ;;  %2504 = vrcp.f32 %v1689_v4  ;;  %v1731_v8 = vand.u32 2147483648, %v1689_v4  ;;  %v1729_v9 = vand.u32 2147483647, %v1689_v4 }
 0x33f   : > { %vm1725_vm1 = vweird.f32 %v1689_v4 }
 0x340   : > { %v3580_v48 = vpop.eup %2502  ;;  %v1684_v3 = vmul.f32 1.442695, %v1654_v35  ;;  %v1732_v43 = vor.u32 1.1754944e-38, %v1731_v8  ;;  %vm1730_vm3 = vcmp.eq.f32.partialorder %v1729_v9, 8.507059e+37 }
 0x341   : > { %1714 = vadd.xlane.f32.xlu2 %v3580_v48 }
 0x342   : > { %2506 = vpow2.f32 %v1684_v3 }
 0x344   : > { %v2505_v49 = vpop.eup %2504 }
 0x345   : > { %v1721_v59 = vmul.f32 %v2505_v49, %v1689_v4  ;;  %v1691_v11 = vpop.xlane.xlu2 %1690  ;;  %v1639_v52 = vpop.xlane.xlu0 %1638  ;;  %vm1726_vm0 = vweird.f32 %v2505_v49 }
 0x346   : > { %2508 = vrcp.f32 %v1691_v11  ;;  %v1655_v42 = vsub.f32 %v3530_v33, %v1639_v52  ;;  %vm1727_vm2 = vmor %vm1725_vm1, %vm1726_vm0  ;;  %v1746_v25 = vand.u32 2147483648, %v1691_v11  ;;  %v1744_v22 = vand.u32 2147483647, %v1691_v11 }
 0x347   : > { %v1722_v53 = vsub.f32 1.0, %v1721_v59  ;;  %vm1740_vm5 = vweird.f32 %v1691_v11 }
 0x348   : > { %v3584_v21 = vpop.eup %2506  ;;  %v1686_v5 = vmul.f32 1.442695, %v1655_v42  ;;  %vm1745_vm7 = vcmp.eq.f32.partialorder %v1744_v22, 8.507059e+37 }
 0x349   : > { %v1723_v50 = vmul.f32 %v2505_v49, %v1722_v53  ;;  %1716 = vadd.xlane.f32.xlu0 %v3584_v21 }
 0x34a   : > { %2510 = vpow2.f32 %v1686_v5 }
 0x34b   : > { %v1724_v58 = vadd.f32 %v2505_v49, %v1723_v50 }
 0x34c   : > { %v2509_v10 = vpop.eup %2508 }
 0x34d   : > { %v1728_v36 = vsel %vm1727_vm2, %v2505_v49, %v1724_v58  ;;  %v1736_v33 = vmul.f32 %v2509_v10, %v1691_v11  ;;  %v1693_v62 = vpop.xlane.xlu0 %1692  ;;  %v1695_v19 = vpop.xlane.xlu1 %1694  ;;  %vm1741_vm4 = vweird.f32 %v2509_v10 }
 0x34e   : > { %v1733_v54 = vsel %vm1730_vm3, %v1732_v43, %v1728_v36  ;;  %2512 = vrcp.f32 %v1693_v62  ;;  %vm1742_vm6 = vmor %vm1740_vm5, %vm1741_vm4  ;;  %v1761_v18 = vand.u32 2147483648, %v1693_v62  ;;  %v1759_v24 = vand.u32 2147483647, %v1693_v62 }
 0x34f   : > { %v1734_v16 = vmul.f32 %v3523_v60, %v1733_v54  ;;  %v1737_v1 = vsub.f32 1.0, %v1736_v33  ;;  %2514 = vrcp.f32 %v1695_v19  ;;  %v1747_v60 = vor.u32 1.1754944e-38, %v1746_v25 }
 0x350   : > { %v3591_v27 = vpop.eup %2510  ;;  %v1776_v63 = vand.u32 2147483648, %v1695_v19  ;;  %v1774_v44 = vand.u32 2147483647, %v1695_v19  ;;  %vm1755_vm10 = vweird.f32 %v1693_v62  ;;  %v1762_v2 = vor.u32 1.1754944e-38, %v1761_v18 }
 0x351   : > { %1960 = vst [vmem:[%s3593_s18] sm:$0xff] %v1734_v16  ;;  %v1738_v26 = vmul.f32 %v2509_v10, %v1737_v1  ;;  %1718 = vadd.xlane.f32.xlu1 %v3591_v27  ;;  %vm1770_vm12 = vweird.f32 %v1695_v19  ;;  %vm1760_vm13 = vcmp.eq.f32.partialorder %v1759_v24, 8.507059e+37 }
 0x352   : > { %v1777_v31 = vor.u32 1.1754944e-38, %v1776_v63  ;;  %vm1775_vm15 = vcmp.eq.f32.partialorder %v1774_v44, 8.507059e+37 }
 0x353   : > { %v1739_v55 = vadd.f32 %v2509_v10, %v1738_v26 }
 0x354   : > { %v2513_v23 = vpop.eup %2512 }
 0x355   : > { %v2515_v17 = vpop.eup %2514  ;;  %v1743_v28 = vsel %vm1742_vm6, %v2509_v10, %v1739_v55  ;;  %v1751_v29 = vmul.f32 %v2513_v23, %v1693_v62  ;;  %vm1756_vm8 = vweird.f32 %v2513_v23 }
 0x356   : > { %v1748_v13 = vsel %vm1745_vm7, %v1747_v60, %v1743_v28  ;;  %v1766_v38 = vmul.f32 %v2515_v17, %v1695_v19  ;;  %vm1771_vm9 = vweird.f32 %v2515_v17  ;;  %vm1757_vm11 = vmor %vm1755_vm10, %vm1756_vm8 }
 0x357   : > { %v1749_v32 = vmul.f32 %v3532_v51, %v1748_v13  ;;  %v1752_v12 = vsub.f32 1.0, %v1751_v29  ;;  %vm1772_vm14 = vmor %vm1770_vm12, %vm1771_vm9 }
 0x358   : > { %v1767_v39 = vsub.f32 1.0, %v1766_v38 }
 0x359   : > { %1961 = vst [vmem:[%s3593_s18 + $0x8] sm:$0xff] %v1749_v32  ;;  %v1753_v7 = vmul.f32 %v2513_v23, %v1752_v12 }
 0x35a   : > { %v1768_v0 = vmul.f32 %v2515_v17, %v1767_v39 }
 0x35b   : > { %v1754_v20 = vadd.f32 %v2513_v23, %v1753_v7 }
 0x35c   : > { %v1769_v46 = vadd.f32 %v2515_v17, %v1768_v0 }
 0x35d   : > { %v1758_v51 = vsel %vm1757_vm11, %v2513_v23, %v1754_v20 }
 0x35e   : > { %v1763_v41 = vsel %vm1760_vm13, %v1762_v2, %v1758_v51  ;;  %v1773_v57 = vsel %vm1772_vm14, %v2515_v17, %v1769_v46 }
 0x35f   : > { %v1764_v4 = vmul.f32 %v3536_v15, %v1763_v41  ;;  %v1778_v35 = vsel %vm1775_vm15, %v1777_v31, %v1773_v57 }
 0x360   : > { %v1779_v3 = vmul.f32 %v3538_v6, %v1778_v35  ;;  %v1697_v49 = vpop.xlane.xlu2 %1696 }
 0x361   : > { %1962 = vst [vmem:[%s3593_s18 + $0x10] sm:$0xff] %v1764_v4  ;;  %2516 = vrcp.f32 %v1697_v49  ;;  %v1791_v42 = vand.u32 2147483648, %v1697_v49  ;;  %v1789_v50 = vand.u32 2147483647, %v1697_v49  ;;  %vm1785_vm1 = vweird.f32 %v1697_v49 }
 0x362   : > { %1963 = vst [vmem:[%s3593_s18 + $0x18] sm:$0xff] %v1779_v3 }
 0x363   : > { %v1792_v5 = vor.u32 1.1754944e-38, %v1791_v42  ;;  %vm1790_vm3 = vcmp.eq.f32.partialorder %v1789_v50, 8.507059e+37 }
 0x367   : > { %v2517_v59 = vpop.eup %2516 }
 0x368   : > { %v1781_v11 = vmul.f32 %v2517_v59, %v1697_v49  ;;  %v1699_v52 = vpop.xlane.xlu0 %1698  ;;  %vm1786_vm0 = vweird.f32 %v2517_v59 }
 0x369   : > { %2518 = vrcp.f32 %v1699_v52  ;;  %vm1787_vm2 = vmor %vm1785_vm1, %vm1786_vm0  ;;  %v1806_v33 = vand.u32 2147483648, %v1699_v52  ;;  %v1804_v19 = vand.u32 2147483647, %v1699_v52  ;;  %vm1800_vm5 = vweird.f32 %v1699_v52 }
 0x36a   : > { %v1782_v53 = vsub.f32 1.0, %v1781_v11 }
 0x36b   : > { %v1807_v16 = vor.u32 1.1754944e-38, %v1806_v33  ;;  %vm1805_vm7 = vcmp.eq.f32.partialorder %v1804_v19, 8.507059e+37 }
 0x36c   : > { %v1783_v8 = vmul.f32 %v2517_v59, %v1782_v53 }
 0x36e   : > { %v1784_v9 = vadd.f32 %v2517_v59, %v1783_v8 }
 0x36f   : > { %v2519_v15 = vpop.eup %2518 }
 0x370   : > { %v1788_v6 = vsel %vm1787_vm2, %v2517_v59, %v1784_v9  ;;  %v1796_v58 = vmul.f32 %v2519_v15, %v1699_v52  ;;  %vm1801_vm4 = vweird.f32 %v2519_v15 }
 0x371   : > { %v1793_v10 = vsel %vm1790_vm3, %v1792_v5, %v1788_v6  ;;  %vm1802_vm6 = vmor %vm1800_vm5, %vm1801_vm4 }
 0x372   : > { %v1794_v43 = vmul.f32 %v3544_v47, %v1793_v10  ;;  %v1797_v36 = vsub.f32 1.0, %v1796_v58 }
 0x374   : > { %1964 = vst [vmem:[%s3593_s18 + $0x20] sm:$0xff] %v1794_v43  ;;  %v1798_v62 = vmul.f32 %v2519_v15, %v1797_v36 }
 0x376   : > { %v1799_v54 = vadd.f32 %v2519_v15, %v1798_v62 }
 0x378   : > { %v1803_v1 = vsel %vm1802_vm6, %v2519_v15, %v1799_v54 }
 0x379   : > { %v1808_v25 = vsel %vm1805_vm7, %v1807_v16, %v1803_v1 }
 0x37a   : > { %v1809_v26 = vmul.f32 %v3547_v14, %v1808_v25 }
 0x37c   : > { %1965 = vst [vmem:[%s3593_s18 + $0x28] sm:$0xff] %v1809_v26  ;;  %v1701_v22 = vpop.xlane.xlu1 %1700 }
 0x37d   : > { %2520 = vrcp.f32 %v1701_v22  ;;  %v1821_v17 = vand.u32 2147483648, %v1701_v22  ;;  %v1819_v29 = vand.u32 2147483647, %v1701_v22  ;;  %vm1815_vm9 = vweird.f32 %v1701_v22 }
 0x37f   : > { %v1822_v32 = vor.u32 1.1754944e-38, %v1821_v17  ;;  %vm1820_vm11 = vcmp.eq.f32.partialorder %v1819_v29, 8.507059e+37 }
 0x383   : > { %v2521_v55 = vpop.eup %2520 }
 0x384   : > { %v1811_v47 = vmul.f32 %v2521_v55, %v1701_v22  ;;  %v1703_v23 = vpop.xlane.xlu2 %1702  ;;  %vm1816_vm8 = vweird.f32 %v2521_v55 }
 0x385   : > { %2522 = vrcp.f32 %v1703_v23  ;;  %vm1817_vm10 = vmor %vm1815_vm9, %vm1816_vm8  ;;  %v1836_v63 = vand.u32 2147483648, %v1703_v23  ;;  %v1834_v44 = vand.u32 2147483647, %v1703_v23  ;;  %vm1830_vm13 = vweird.f32 %v1703_v23 }
 0x386   : > { %v1812_v60 = vsub.f32 1.0, %v1811_v47 }
 0x387   : > { %v1837_v46 = vor.u32 1.1754944e-38, %v1836_v63  ;;  %vm1835_vm15 = vcmp.eq.f32.partialorder %v1834_v44, 8.507059e+37 }
 0x388   : > { %v1813_v28 = vmul.f32 %v2521_v55, %v1812_v60 }
 0x38a   : > { %v1814_v13 = vadd.f32 %v2521_v55, %v1813_v28 }
 0x38b   : > { %v2523_v38 = vpop.eup %2522 }
 0x38c   : > { %v1818_v12 = vsel %vm1817_vm10, %v2521_v55, %v1814_v13  ;;  %v1826_v14 = vmul.f32 %v2523_v38, %v1703_v23  ;;  %v1705_v18 = vpop.xlane.xlu0 %1704  ;;  %vm1831_vm12 = vweird.f32 %v2523_v38 }
 0x38d   : > { %v1823_v39 = vsel %vm1820_vm11, %v1822_v32, %v1818_v12  ;;  %2524 = vrcp.f32 %v1705_v18  ;;  %vm1832_vm14 = vmor %vm1830_vm13, %vm1831_vm12  ;;  %v1851_v35 = vand.u32 2147483648, %v1705_v18  ;;  %v1849_v49 = vand.u32 2147483647, %v1705_v18 }
 0x38e   : > { %v1824_v7 = vmul.f32 %v3552_v37, %v1823_v39  ;;  %v1827_v24 = vsub.f32 1.0, %v1826_v14  ;;  %vm1845_vm1 = vweird.f32 %v1705_v18 }
 0x38f   : > { %v1852_v52 = vor.u32 1.1754944e-38, %v1851_v35  ;;  %vm1850_vm3 = vcmp.eq.f32.partialorder %v1849_v49, 8.507059e+37 }
 0x390   : > { %1966 = vst [vmem:[%s3593_s18 + $0x30] sm:$0xff] %v1824_v7  ;;  %v1828_v0 = vmul.f32 %v2523_v38, %v1827_v24 }
 0x392   : > { %v1829_v20 = vadd.f32 %v2523_v38, %v1828_v0 }
 0x393   : > { %v2525_v2 = vpop.eup %2524 }
 0x394   : > { %v1833_v51 = vsel %vm1832_vm14, %v2523_v38, %v1829_v20  ;;  %v1841_v31 = vmul.f32 %v2525_v2, %v1705_v18  ;;  %v1707_v41 = vpop.xlane.xlu1 %1706  ;;  %vm1846_vm0 = vweird.f32 %v2525_v2 }
 0x395   : > { %v1838_v57 = vsel %vm1835_vm15, %v1837_v46, %v1833_v51  ;;  %2526 = vrcp.f32 %v1707_v41  ;;  %vm1847_vm2 = vmor %vm1845_vm1, %vm1846_vm0  ;;  %v1866_v15 = vand.u32 2147483648, %v1707_v41  ;;  %v1864_v6 = vand.u32 2147483647, %v1707_v41 }
 0x396   : > { %v1839_v37 = vmul.f32 %v3556_v30, %v1838_v57  ;;  %v1842_v4 = vsub.f32 1.0, %v1841_v31  ;;  %vm1860_vm5 = vweird.f32 %v1707_v41 }
 0x397   : > { %v1867_v43 = vor.u32 1.1754944e-38, %v1866_v15  ;;  %vm1865_vm7 = vcmp.eq.f32.partialorder %v1864_v6, 8.507059e+37 }
 0x398   : > { %1967 = vst [vmem:[%s3593_s18 + $0x38] sm:$0xff] %v1839_v37  ;;  %v1843_v3 = vmul.f32 %v2525_v2, %v1842_v4 }
 0x39a   : > { %v1844_v59 = vadd.f32 %v2525_v2, %v1843_v3 }
 0x39b   : > { %v2527_v11 = vpop.eup %2526 }
 0x39c   : > { %v1848_v53 = vsel %vm1847_vm2, %v2525_v2, %v1844_v59  ;;  %v1856_v42 = vmul.f32 %v2527_v11, %v1707_v41  ;;  %v1709_v8 = vpop.xlane.xlu2 %1708  ;;  %vm1861_vm4 = vweird.f32 %v2527_v11 }
 0x39d   : > { %v1853_v50 = vsel %vm1850_vm3, %v1852_v52, %v1848_v53  ;;  %2528 = vrcp.f32 %v1709_v8  ;;  %vm1862_vm6 = vmor %vm1860_vm5, %vm1861_vm4  ;;  %v1881_v16 = vand.u32 2147483648, %v1709_v8  ;;  %v1879_v25 = vand.u32 2147483647, %v1709_v8 }
 0x39e   : > { %v1854_v30 = vmul.f32 %v3560_v56, %v1853_v50  ;;  %v1857_v9 = vsub.f32 1.0, %v1856_v42  ;;  %vm1875_vm9 = vweird.f32 %v1709_v8 }
 0x39f   : > { %v1882_v55 = vor.u32 1.1754944e-38, %v1881_v16  ;;  %vm1880_vm11 = vcmp.eq.f32.partialorder %v1879_v25, 8.507059e+37 }
 0x3a0   : > { %1968 = vst [vmem:[%s3593_s18 + $0x40] sm:$0xff] %v1854_v30  ;;  %v1858_v5 = vmul.f32 %v2527_v11, %v1857_v9 }
 0x3a2   : > { %v1859_v58 = vadd.f32 %v2527_v11, %v1858_v5 }
 0x3a3   : > { %v2529_v10 = vpop.eup %2528 }
 0x3a4   : > { %v1863_v36 = vsel %vm1862_vm6, %v2527_v11, %v1859_v58  ;;  %v1871_v33 = vmul.f32 %v2529_v10, %v1709_v8  ;;  %v1711_v62 = vpop.xlane.xlu0 %1710  ;;  %vm1876_vm8 = vweird.f32 %v2529_v10 }
 0x3a5   : > { %v1868_v19 = vsel %vm1865_vm7, %v1867_v43, %v1863_v36  ;;  %2530 = vrcp.f32 %v1711_v62  ;;  %vm1877_vm10 = vmor %vm1875_vm9, %vm1876_vm8  ;;  %v1896_v29 = vand.u32 2147483648, %v1711_v62  ;;  %v1894_v38 = vand.u32 2147483647, %v1711_v62 }
 0x3a6   : > { %v1869_v56 = vmul.f32 %v3564_v34, %v1868_v19  ;;  %v1872_v54 = vsub.f32 1.0, %v1871_v33  ;;  %vm1890_vm13 = vweird.f32 %v1711_v62 }
 0x3a7   : > { %v1897_v14 = vor.u32 1.1754944e-38, %v1896_v29  ;;  %vm1895_vm15 = vcmp.eq.f32.partialorder %v1894_v38, 8.507059e+37 }
 0x3a8   : > { %1969 = vst [vmem:[%s3593_s18 + $0x48] sm:$0xff] %v1869_v56  ;;  %v1873_v1 = vmul.f32 %v2529_v10, %v1872_v54 }
 0x3aa   : > { %v1874_v26 = vadd.f32 %v2529_v10, %v1873_v1 }
 0x3ab   : > { %v2531_v22 = vpop.eup %2530 }
 0x3ac   : > { %v1878_v47 = vsel %vm1877_vm10, %v2529_v10, %v1874_v26  ;;  %v1886_v23 = vmul.f32 %v2531_v22, %v1711_v62  ;;  %v1713_v60 = vpop.xlane.xlu1 %1712  ;;  %vm1891_vm12 = vweird.f32 %v2531_v22 }
 0x3ad   : > { %v1883_v17 = vsel %vm1880_vm11, %v1882_v55, %v1878_v47  ;;  %2532 = vrcp.f32 %v1713_v60  ;;  %vm1892_vm14 = vmor %vm1890_vm13, %vm1891_vm12  ;;  %v1911_v0 = vand.u32 2147483648, %v1713_v60  ;;  %v1909_v20 = vand.u32 2147483647, %v1713_v60 }
 0x3ae   : > { %v1884_v34 = vmul.f32 %v3568_v40, %v1883_v17  ;;  %v1887_v28 = vsub.f32 1.0, %v1886_v23  ;;  %vm1905_vm1 = vweird.f32 %v1713_v60 }
 0x3af   : > { %v1912_v51 = vor.u32 1.1754944e-38, %v1911_v0  ;;  %vm1910_vm3 = vcmp.eq.f32.partialorder %v1909_v20, 8.507059e+37 }
 0x3b0   : > { %1970 = vst [vmem:[%s3593_s18 + $0x50] sm:$0xff] %v1884_v34  ;;  %v1888_v13 = vmul.f32 %v2531_v22, %v1887_v28 }
 0x3b2   : > { %v1889_v32 = vadd.f32 %v2531_v22, %v1888_v13 }
 0x3b3   : > { %v2533_v12 = vpop.eup %2532 }
 0x3b4   : > { %v1893_v18 = vsel %vm1892_vm14, %v2531_v22, %v1889_v32  ;;  %v1901_v39 = vmul.f32 %v2533_v12, %v1713_v60  ;;  %v1715_v7 = vpop.xlane.xlu2 %1714  ;;  %vm1906_vm0 = vweird.f32 %v2533_v12 }
 0x3b5   : > { %v1898_v24 = vsel %vm1895_vm15, %v1897_v14, %v1893_v18  ;;  %2534 = vrcp.f32 %v1715_v7  ;;  %vm1907_vm2 = vmor %vm1905_vm1, %vm1906_vm0  ;;  %v1926_v35 = vand.u32 2147483648, %v1715_v7  ;;  %v1924_v49 = vand.u32 2147483647, %v1715_v7 }
 0x3b6   : > { %v1899_v40 = vmul.f32 %v3572_v45, %v1898_v24  ;;  %v1902_v63 = vsub.f32 1.0, %v1901_v39  ;;  %vm1920_vm5 = vweird.f32 %v1715_v7 }
 0x3b7   : > { %v1927_v52 = vor.u32 1.1754944e-38, %v1926_v35  ;;  %vm1925_vm7 = vcmp.eq.f32.partialorder %v1924_v49, 8.507059e+37 }
 0x3b8   : > { %1971 = vst [vmem:[%s3593_s18 + $0x58] sm:$0xff] %v1899_v40  ;;  %v1903_v44 = vmul.f32 %v2533_v12, %v1902_v63 }
 0x3ba   : > { %v1904_v2 = vadd.f32 %v2533_v12, %v1903_v44 }
 0x3bb   : > { %v2535_v46 = vpop.eup %2534 }
 0x3bc   : > { %v1908_v31 = vsel %vm1907_vm2, %v2533_v12, %v1904_v2  ;;  %v1916_v41 = vmul.f32 %v2535_v46, %v1715_v7  ;;  %v1717_v57 = vpop.xlane.xlu0 %1716  ;;  %vm1921_vm4 = vweird.f32 %v2535_v46 }
 0x3bd   : > { %v1913_v37 = vsel %vm1910_vm3, %v1912_v51, %v1908_v31  ;;  %2536 = vrcp.f32 %v1717_v57  ;;  %vm1922_vm6 = vmor %vm1920_vm5, %vm1921_vm4  ;;  %v1941_v9 = vand.u32 2147483648, %v1717_v57  ;;  %v1939_v5 = vand.u32 2147483647, %v1717_v57 }
 0x3be   : > { %v1914_v45 = vmul.f32 %v3576_v61, %v1913_v37  ;;  %v1917_v4 = vsub.f32 1.0, %v1916_v41  ;;  %vm1935_vm9 = vweird.f32 %v1717_v57 }
 0x3bf   : > { %v1942_v58 = vor.u32 1.1754944e-38, %v1941_v9  ;;  %vm1940_vm11 = vcmp.eq.f32.partialorder %v1939_v5, 8.507059e+37 }
 0x3c0   : > { %1972 = vst [vmem:[%s3593_s18 + $0x60] sm:$0xff] %v1914_v45  ;;  %v1918_v3 = vmul.f32 %v2535_v46, %v1917_v4 }
 0x3c2   : > { %v1919_v59 = vadd.f32 %v2535_v46, %v1918_v3 }
 0x3c3   : > { %v2537_v11 = vpop.eup %2536 }
 0x3c4   : > { %v1923_v53 = vsel %vm1922_vm6, %v2535_v46, %v1919_v59  ;;  %v1931_v42 = vmul.f32 %v2537_v11, %v1717_v57  ;;  %v1719_v50 = vpop.xlane.xlu1 %1718  ;;  %vm1936_vm8 = vweird.f32 %v2537_v11 }
 0x3c5   : > { %v1928_v8 = vsel %vm1925_vm7, %v1927_v52, %v1923_v53  ;;  %2538 = vrcp.f32 %v1719_v50  ;;  %vm1937_vm10 = vmor %vm1935_vm9, %vm1936_vm8  ;;  %v1956_v19 = vand.u32 2147483648, %v1719_v50  ;;  %v1954_v54 = vand.u32 2147483647, %v1719_v50 }
 0x3c6   : > { %v1929_v30 = vmul.f32 %v3580_v48, %v1928_v8  ;;  %v1932_v61 = vsub.f32 1.0, %v1931_v42  ;;  %vm1950_vm13 = vweird.f32 %v1719_v50 }
 0x3c7   : > { %v1957_v1 = vor.u32 1.1754944e-38, %v1956_v19  ;;  %vm1955_vm15 = vcmp.eq.f32.partialorder %v1954_v54, 8.507059e+37 }
 0x3c8   : > { %1973 = vst [vmem:[%s3593_s18 + $0x68] sm:$0xff] %v1929_v30  ;;  %v1933_v15 = vmul.f32 %v2537_v11, %v1932_v61 }
 0x3ca   : > { %v1934_v6 = vadd.f32 %v2537_v11, %v1933_v15 }
 0x3cb   : > { %v2539_v10 = vpop.eup %2538 }
 0x3cc   : > { %v1938_v43 = vsel %vm1937_vm10, %v2537_v11, %v1934_v6  ;;  %v1946_v33 = vmul.f32 %v2539_v10, %v1719_v50  ;;  %vm1951_vm12 = vweird.f32 %v2539_v10 }
 0x3cd   : > { %v1943_v36 = vsel %vm1940_vm11, %v1942_v58, %v1938_v43  ;;  %vm1952_vm14 = vmor %vm1950_vm13, %vm1951_vm12 }
 0x3ce   : > { %v1944_v48 = vmul.f32 %v3584_v21, %v1943_v36  ;;  %v1947_v62 = vsub.f32 1.0, %v1946_v33 }
 0x3d0   : > { %1974 = vst [vmem:[%s3593_s18 + $0x70] sm:$0xff] %v1944_v48  ;;  %v1948_v56 = vmul.f32 %v2539_v10, %v1947_v62 }
 0x3d2   : > { %v1949_v16 = vadd.f32 %v2539_v10, %v1948_v56 }
 0x3d4   : > { %v1953_v21 = vsel %vm1952_vm14, %v2539_v10, %v1949_v16 }
 0x3d5   : > { %v1958_v25 = vsel %vm1955_vm15, %v1957_v1, %v1953_v21 }
 0x3d6   : > { %v1959_v26 = vmul.f32 %v3591_v27, %v1958_v25 }
 0x3d8   : > { %1975 = vst [vmem:[%s3593_s18 + $0x78] sm:$0xff] %v1959_v26 }
 0x3d9   : > { %2627 = shalt.err (!%p2624_p8)
}
 0x3da   : > { %s2680_s15 = smov 128   ;;  %s2681_s18 = smov 8  }
 0x3db   : > { %2357 = dma.vmem_to_hbm [thread:$0]  (%p2760_p5), %s1990_s22, 2048, %s1992_s23, %s1977_s28, %s2680_s15, %s2680_s15, %s2681_s18  }
 0x3dc PF: > { %p2374_p9 = scmp.ge.s32.totalorder %s2670_s27, 2  ;;  %s2006_s16 = sand.u32 1, %s2658_s24  }
 0x3dd   : > { %s2007_s20 = scalar_lea.sflag [#allocation4], %s2006_s16 }
 0x3de   : > { %p2367_p10 = pnand %p2374_p9, %p2764_p6 }
 0x3e0   : > { %p2368_p11 = pneg %p2367_p10 }
 0x3e2   : > { %2653 = dma.done.wait (%p2368_p11), %s2007_s20, 2048  }
 0x3e3   : > { %2655 = vsyncadd (%p2368_p11), %s2007_s20, 4294965248  ;;  %p19_p12 = scmp.ge.s32.totalorder %s2747_s30, 4   ;;  %s3672_s24 = smov %s2662_s25 }
 0x3e4   : > { %s3673_s25 = smov %s2666_s26  ;;  %s3674_s26 = smov %s2758_s10 }
 0x3e5   : > { %s3675_s27 = smov %s2747_s30  ;;  %21 = sbr.rel (!%p19_p12) target bundleno = 5 (0x5), region = 92 }
 0x3ea   :  { %2013 = vsyncpa [#allocation3], 1 }
 0x3eb   :  { %2015 = vsyncpa [#allocation3 + $0x1], 1 }
 0x3ec   :  { %2016 = vsyncpa [#allocation6], 1 }
 0x3ed   :  { %2017 = vsyncpa [#allocation4], 1 }
 0x3ee   :  { %2019 = vsyncpa [#allocation4 + $0x1], 1 }

</bundles_post_ra>
